<compile_context>
chip_gen: v6e
topology: v6e:2x2x1
jax: 0.10.0
libtpu: 0.0.40
codegen_flags: <defaults>
</compile_context>

<pallas_src>
import functools

import jax
import jax.numpy as jnp
from jax.experimental import pallas as pl
from jax.experimental.pallas import tpu as pltpu


def _round_up(x, m):
    return ((x + m - 1) // m) * m


# ----------------------------- fused Pallas kernel ---------------------------

def _cnn_kernel(x_ref, b1_ref, b1b_ref, b2_ref, b2b_ref,
                wf1_ref, bf1_ref, wf2_ref, bf2_ref, wf3_ref, bf3_ref, o_ref):
    f32 = jnp.float32
    mxdt = b1_ref.dtype                      # matmul operand dtype (f32 or bf16)
    tb = x_ref.shape[1]                      # batch tile (multiple of 8)

    # ---- conv1 (1->4, k=5, valid) as 5 banded MXU matmuls.
    # rows = (oh, n)  (h-major, batch in sublanes), cols = ow*4 + oc.
    x2d = x_ref[...].reshape(28 * tb, 28)    # hoisted, layout-preserving (tb%8==0)
    B1 = b1_ref[...]                         # [5, 28, 96]
    acc1 = jnp.dot(x2d[0:24 * tb], B1[0], preferred_element_type=f32)
    for kh in range(1, 5):
        acc1 = acc1 + jnp.dot(x2d[kh * tb:(kh + 24) * tb], B1[kh],
                              preferred_element_type=f32)
    h1 = jnp.maximum(acc1 + b1b_ref[...], 0.0)                   # [24*tb, 96] f32

    # ---- maxpool 2x2 (conv1): W pair-max (lane shift) + H pair-max via a
    # layout-preserving reshape (one vector max, no concatenations).
    pm = jnp.maximum(h1[:, 0:92], h1[:, 4:96]).reshape(12, 2, tb, 92)
    p1 = jnp.maximum(pm[:, 0], pm[:, 1]).reshape(12 * tb, 92)    # rows = (h2, n)
    p1 = p1.astype(mxdt)

    # ---- conv2 (4->12, k=5, valid): pool1 W-compaction folded into the banded
    # weights host-side, so conv2 consumes the 92-lane pooled activations.
    B2 = b2_ref[...]                                             # [5, 92, 96]
    acc2 = jnp.dot(p1[0:8 * tb], B2[0], preferred_element_type=f32)
    for kh in range(1, 5):
        acc2 = acc2 + jnp.dot(p1[kh * tb:(kh + 8) * tb], B2[kh],
                              preferred_element_type=f32)
    h2 = jnp.maximum(acc2 + b2b_ref[...], 0.0)                   # [8*tb, 96] f32

    # ---- maxpool 2x2 (conv2): keep the result as [4, tb, 84] (no lane concat).
    pm2 = jnp.maximum(h2[:, 0:84], h2[:, 12:96]).reshape(4, 2, tb, 84)
    p2 = jnp.maximum(pm2[:, 0], pm2[:, 1]).astype(mxdt)          # [4, tb, 84]

    # ---- fc1 as 4 accumulating banded matmuls over the pooled-H blocks
    # (pool2 W-compaction + PyTorch NCHW flatten permutation folded into Wf1b).
    Wf1b = wf1_ref[...]                                          # [4, 84, 120]
    z1 = jnp.dot(p2[0], Wf1b[0], preferred_element_type=f32)
    for hb in range(1, 4):
        z1 = z1 + jnp.dot(p2[hb], Wf1b[hb], preferred_element_type=f32)
    z1 = jnp.maximum(z1 + bf1_ref[...], 0.0).astype(mxdt)        # [tb, 120]

    # ---- fc2 / fc3 + log_softmax (padded class lanes carry -1e30 logits).
    z2 = jnp.maximum(jnp.dot(z1, wf2_ref[...], preferred_element_type=f32)
                     + bf2_ref[...], 0.0).astype(mxdt)           # [tb, 100]
    logits = jnp.dot(z2, wf3_ref[...], preferred_element_type=f32) + bf3_ref[...]
    m = jnp.max(logits, axis=-1, keepdims=True)
    zc = logits - m
    lse = jnp.log(jnp.sum(jnp.exp(zc), axis=-1, keepdims=True))
    o_ref[...] = (zc - lse).astype(o_ref.dtype)                  # [tb, 128]


# --------------------------- host-side weight prep ---------------------------

def _prep_operands(params, ncp, mxdt):
    f32 = jnp.float32
    w1 = params["conv1_w"].astype(f32)[:, 0]             # [4, 5, 5]
    b1 = params["conv1_b"].astype(f32)
    w2 = params["conv2_w"].astype(f32)                   # [12, 4, 5, 5]
    b2 = params["conv2_b"].astype(f32)
    fc1_w = params["fc1_w"].astype(f32)
    fc1_b = params["fc1_b"].astype(f32)
    fc2_w = params["fc2_w"].astype(f32)
    fc2_b = params["fc2_b"].astype(f32)
    fc3_w = params["fc3_w"].astype(f32)
    fc3_b = params["fc3_b"].astype(f32)
    nc = fc3_w.shape[0]

    # conv1 banded weights: B1[kh, w_in, ow*4+oc] = w1[oc, kh, w_in-ow] if 0<=w_in-ow<5
    kh = jnp.arange(5)[:, None, None]
    w_in = jnp.arange(28)[None, :, None]
    col = jnp.arange(96)[None, None, :]
    ow, oc = col // 4, col % 4
    kw = w_in - ow
    B1 = jnp.where((kw >= 0) & (kw < 5),
                   w1[oc, kh, jnp.clip(kw, 0, 4)], 0.0)          # [5, 28, 96]
    b1row = jnp.tile(b1, 24).reshape(1, 96)

    # pool1 W-compaction selector (picks even-w pair-maxes, per channel)
    r = jnp.arange(92)
    c = jnp.arange(48)
    S1w = (((r[:, None] // 4) == 2 * (c[None, :] // 4)) &
           ((r[:, None] % 4) == (c[None, :] % 4))).astype(f32)   # [92, 48]

    # conv2 banded weights over compact pool1 lanes:
    #   B2[kh, pw1*4+ic, ow2*12+oc] = w2[oc, ic, kh, pw1-ow2]
    row = jnp.arange(48)[None, :, None]
    col2 = jnp.arange(96)[None, None, :]
    pw1, ic = row // 4, row % 4
    ow2, oc2 = col2 // 12, col2 % 12
    kw2 = pw1 - ow2
    B2 = jnp.where((kw2 >= 0) & (kw2 < 5),
                   w2[oc2, ic, kh, jnp.clip(kw2, 0, 4)], 0.0)    # [5, 48, 96]
    # Fold the pool1 W-compaction into the bands: conv2 consumes 92-lane input.
    B2p = jnp.einsum("rc,kcm->krm", S1w, B2)                     # [5, 92, 96]
    b2row = jnp.tile(b2, 8).reshape(1, 96)

    # fc1 banded over the 4 pooled-H blocks, with the pool2 W-compaction and
    # the PyTorch NCHW-flatten permutation folded in.
    # Kernel lane l (0..83) is (w_pair=l//12, oc=l%12); a valid pooled width
    # pw=l//24 exists only when l%24 < 12 (even w_pair); PyTorch flat column
    # for pooled feature (oc, hb, pw) is oc*16 + hb*4 + pw.
    l = jnp.arange(84)
    occ = l % 12
    pw = l // 24
    valid = (l % 24) < 12
    blocks = []
    for hb in range(4):
        j = occ * 16 + hb * 4 + pw
        blocks.append(jnp.where(valid[:, None], fc1_w[:, j].T, 0.0))  # [84, 120]
    Wf1b = jnp.stack(blocks)                                     # [4, 84, 120]
    bf1 = fc1_b.reshape(1, 120)

    Wf2 = fc2_w.T                                                # [120, 100]
    bf2 = fc2_b.reshape(1, 100)
    Wf3 = jnp.zeros((100, ncp), f32).at[:, :nc].set(fc3_w.T)     # [100, ncp]
    bf3 = jnp.full((1, ncp), -1e30, f32).at[0, :nc].set(fc3_b)

    # Matmul operands in the MXU dtype; biases stay f32.
    B1, B2p, Wf1b, Wf2, Wf3 = (m.astype(mxdt) for m in (B1, B2p, Wf1b, Wf2, Wf3))
    return (B1, b1row, B2p, b2row, Wf1b, bf1, Wf2, bf2, Wf3, bf3)


# ------------------------- generation-aware tile choice ----------------------

def _device_kind():
    try:
        return jax.devices()[0].device_kind.lower()
    except Exception:
        return ""


def _tile_config(kind, mx_itemsize):
    # v6e (and v5p): 128 MiB VMEM -> big tiles.  v5e: glue-bound, 1 vst slot,
    # don't grow beyond 256.  v7x / unknown: 64 MiB VMEM, 2 TCs -> smaller tile
    # and a conservative scoped-VMEM cap.
    if "v6" in kind:
        return (512 if mx_itemsize < 4 else 256), 64 * 1024 * 1024
    if "v5" in kind:
        return 256, 64 * 1024 * 1024
    return (256 if mx_itemsize < 4 else 192), 48 * 1024 * 1024


def _pick_batch_tile(n, target):
    tb = min(target, _round_up(max(n, 1), 8))
    # Prefer >= 2 grid steps for large batches so both v7x TensorCores get work.
    if n > 128 and _round_up(n, tb) // tb < 2:
        tb = max(8, _round_up((n + 1) // 2, 8))
    return tb


# --------------------------------- wrapper -----------------------------------

def cnn_femnist_forward(params, x, *, matmul_dtype=jnp.bfloat16):
    """x: [N, 1, 28, 28] (NCHW, as in PyTorch). Returns [N, num_classes] f32."""
    N = x.shape[0]
    num_classes = params["fc3_w"].shape[0]
    ncp = _round_up(max(num_classes, 1), 128)            # lane-dense output

    itemsize = jnp.dtype(matmul_dtype).itemsize
    target_tb, vmem_bytes = _tile_config(_device_kind(), itemsize)
    tb = _pick_batch_tile(N, target_tb)
    Np = _round_up(N, tb)

    # (H, N, W) layout: batch in sublanes -> all in-kernel row slices are
    # static, sublane-aligned multiples of tb.  Under jit the transpose, pad
    # and cast below fuse into a single producer copy feeding the kernel.
    xt = jnp.transpose(x.reshape(N, 28, 28), (1, 0, 2)).astype(matmul_dtype)
    xt = jnp.pad(xt, ((0, 0), (0, Np - N), (0, 0)))      # [28, Np, 28]

    ops = _prep_operands(params, ncp, matmul_dtype)

    def full_spec(arr):
        nd = arr.ndim
        return pl.BlockSpec(arr.shape, lambda i, _nd=nd: (0,) * _nd)

    grid_spec = pltpu.PrefetchScalarGridSpec(
        num_scalar_prefetch=0,
        grid=(Np // tb,),
        in_specs=[pl.BlockSpec((28, tb, 28), lambda i: (0, i, 0))]  # x (batch tiled)
                 + [full_spec(a) for a in ops],                     # resident weights
        out_specs=pl.BlockSpec((tb, ncp), lambda i: (i, 0)),
    )

    out = pl.pallas_call(
        _cnn_kernel,
        out_shape=jax.ShapeDtypeStruct((Np, ncp), jnp.float32),
        grid_spec=grid_spec,
        compiler_params=pltpu.CompilerParams(
            dimension_semantics=("parallel",),
            vmem_limit_bytes=vmem_bytes,
        ),
    )(xt, *ops)

    return out[:N, :num_classes]


# ------------------------------ parameter init -------------------------------

def init_params(key, num_classes=10):
    ks = jax.random.split(key, 10)

    def u(k, shape, fan_in):
        bound = 1.0 / jnp.sqrt(jnp.float32(fan_in))
        return jax.random.uniform(k, shape, jnp.float32, -bound, bound)

    return {
        "conv1_w": u(ks[0], (4, 1, 5, 5), 1 * 5 * 5),
        "conv1_b": u(ks[1], (4,), 1 * 5 * 5),
        "conv2_w": u(ks[2], (12, 4, 5, 5), 4 * 5 * 5),
        "conv2_b": u(ks[3], (12,), 4 * 5 * 5),
        "fc1_w":   u(ks[4], (120, 192), 192),
        "fc1_b":   u(ks[5], (120,), 192),
        "fc2_w":   u(ks[6], (100, 120), 120),
        "fc2_b":   u(ks[7], (100,), 120),
        "fc3_w":   u(ks[8], (num_classes, 100), 100),
        "fc3_b":   u(ks[9], (num_classes,), 100),
    }


# ----------------------------- pure-JAX reference ----------------------------

def reference_forward(params, x):
    dn = ("NCHW", "OIHW", "NCHW")
    y = jax.lax.conv_general_dilated(x, params["conv1_w"], (1, 1), "VALID",
                                     dimension_numbers=dn)
    y = jax.nn.relu(y + params["conv1_b"][None, :, None, None])
    y = jax.lax.reduce_window(y, -jnp.inf, jax.lax.max,
                              (1, 1, 2, 2), (1, 1, 2, 2), "VALID")
    y = jax.lax.conv_general_dilated(y, params["conv2_w"], (1, 1), "VALID",
                                     dimension_numbers=dn)
    y = jax.nn.relu(y + params["conv2_b"][None, :, None, None])
    y = jax.lax.reduce_window(y, -jnp.inf, jax.lax.max,
                              (1, 1, 2, 2), (1, 1, 2, 2), "VALID")
    y = y.reshape(y.shape[0], -1)
    y = jax.nn.relu(y @ params["fc1_w"].T + params["fc1_b"])
    y = jax.nn.relu(y @ params["fc2_w"].T + params["fc2_b"])
    y = y @ params["fc3_w"].T + params["fc3_b"]
    return jax.nn.log_softmax(y, axis=1)


if __name__ == "__main__":
    key = jax.random.PRNGKey(0)
    pkey, xkey = jax.random.split(key)
    params = init_params(pkey, num_classes=10)
    x = jax.random.normal(xkey, (2, 1, 28, 28), dtype=jnp.float32)

    ref = jax.block_until_ready(reference_forward(params, x))

    # f32 matmul path: tight match against the f32 reference.
    fwd_f32 = jax.jit(functools.partial(cnn_femnist_forward,
                                        matmul_dtype=jnp.float32))
    out_f32 = jax.block_until_ready(fwd_f32(params, x))
    assert out_f32.shape == (2, 10)
    assert jnp.allclose(out_f32, ref, atol=1e-4, rtol=1e-4), "f32 mismatch"

    # bf16 MXU-operand path (default perf mode): looser tolerance.
    fwd_bf16 = jax.jit(cnn_femnist_forward)
    out_bf16 = jax.block_until_ready(fwd_bf16(params, x))
    assert out_bf16.shape == (2, 10)
    assert jnp.allclose(out_bf16, ref, atol=5e-2, rtol=5e-2), "bf16 mismatch"

    print("KERNEL_OK")
</pallas_src>

<mosaic_0001>
module attributes {stable_mosaic.version = 11 : i64} {
  func.func @_cnn_kernel(%arg0: i32, %arg1: memref<28x8x28xf32, #tpu.memory_space<vmem>>, %arg2: memref<5x28x96xf32, #tpu.memory_space<vmem>>, %arg3: memref<1x96xf32, #tpu.memory_space<vmem>>, %arg4: memref<5x92x96xf32, #tpu.memory_space<vmem>>, %arg5: memref<1x96xf32, #tpu.memory_space<vmem>>, %arg6: memref<4x84x120xf32, #tpu.memory_space<vmem>>, %arg7: memref<1x120xf32, #tpu.memory_space<vmem>>, %arg8: memref<120x100xf32, #tpu.memory_space<vmem>>, %arg9: memref<1x100xf32, #tpu.memory_space<vmem>>, %arg10: memref<100x128xf32, #tpu.memory_space<vmem>>, %arg11: memref<1x128xf32, #tpu.memory_space<vmem>>, %arg12: memref<8x128xf32, #tpu.memory_space<vmem>>) attributes {dimension_semantics = [#tpu.dimension_semantics<parallel>], iteration_bounds = array<i64: 1>, scalar_prefetch = 0 : i64, scratch_operands = 0 : i64, tpu.core_type = #tpu.core_type<tc>, window_params = [{transform_indices = @transform_0, window_bounds = array<i64: 28, 8, 28>}, {pipeline_mode = #tpu.pipeline_mode<synchronous>, transform_indices = @transform_1, window_bounds = array<i64: 5, 28, 96>}, {pipeline_mode = #tpu.pipeline_mode<synchronous>, transform_indices = @transform_2, window_bounds = array<i64: 1, 96>}, {pipeline_mode = #tpu.pipeline_mode<synchronous>, transform_indices = @transform_3, window_bounds = array<i64: 5, 92, 96>}, {pipeline_mode = #tpu.pipeline_mode<synchronous>, transform_indices = @transform_4, window_bounds = array<i64: 1, 96>}, {pipeline_mode = #tpu.pipeline_mode<synchronous>, transform_indices = @transform_5, window_bounds = array<i64: 4, 84, 120>}, {pipeline_mode = #tpu.pipeline_mode<synchronous>, transform_indices = @transform_6, window_bounds = array<i64: 1, 120>}, {pipeline_mode = #tpu.pipeline_mode<synchronous>, transform_indices = @transform_7, window_bounds = array<i64: 120, 100>}, {pipeline_mode = #tpu.pipeline_mode<synchronous>, transform_indices = @transform_8, window_bounds = array<i64: 1, 100>}, {pipeline_mode = #tpu.pipeline_mode<synchronous>, transform_indices = @transform_9, window_bounds = array<i64: 100, 128>}, {pipeline_mode = #tpu.pipeline_mode<synchronous>, transform_indices = @transform_10, window_bounds = array<i64: 1, 128>}, {transform_indices = @transform_11, window_bounds = array<i64: 8, 128>}]} {
    %c0 = arith.constant 0 : index
    %c0_0 = arith.constant 0 : index
    %c0_1 = arith.constant 0 : index
    %0 = vector.load %arg1[%c0, %c0_0, %c0_1] : memref<28x8x28xf32, #tpu.memory_space<vmem>>, vector<28x8x28xf32>
    %1 = vector.shape_cast %0 : vector<28x8x28xf32> to vector<224x28xf32>
    %c0_2 = arith.constant 0 : index
    %c0_3 = arith.constant 0 : index
    %c0_4 = arith.constant 0 : index
    %2 = vector.load %arg2[%c0_2, %c0_3, %c0_4] : memref<5x28x96xf32, #tpu.memory_space<vmem>>, vector<5x28x96xf32>
    %3 = vector.extract_strided_slice %1 {offsets = [0, 0], sizes = [192, 28], strides = [1, 1]} : vector<224x28xf32> to vector<192x28xf32>
    %4 = vector.extract_strided_slice %2 {offsets = [0, 0, 0], sizes = [1, 28, 96], strides = [1, 1, 1]} : vector<5x28x96xf32> to vector<1x28x96xf32>
    %5 = vector.shape_cast %4 : vector<1x28x96xf32> to vector<28x96xf32>
    %cst = arith.constant dense<0.000000e+00> : vector<192x96xf32>
    %6 = tpu.matmul %3, %5, %cst {dimension_numbers = #tpu.dot_dimension_numbers<[1], [0], [0], [1], [0, 0, 1, 1], [], []>} : vector<192x28xf32>, vector<28x96xf32>, vector<192x96xf32> -> vector<192x96xf32>
    %7 = vector.extract_strided_slice %1 {offsets = [8, 0], sizes = [192, 28], strides = [1, 1]} : vector<224x28xf32> to vector<192x28xf32>
    %8 = vector.extract_strided_slice %2 {offsets = [1, 0, 0], sizes = [1, 28, 96], strides = [1, 1, 1]} : vector<5x28x96xf32> to vector<1x28x96xf32>
    %9 = vector.shape_cast %8 : vector<1x28x96xf32> to vector<28x96xf32>
    %cst_5 = arith.constant dense<0.000000e+00> : vector<192x96xf32>
    %10 = tpu.matmul %7, %9, %cst_5 {dimension_numbers = #tpu.dot_dimension_numbers<[1], [0], [0], [1], [0, 0, 1, 1], [], []>} : vector<192x28xf32>, vector<28x96xf32>, vector<192x96xf32> -> vector<192x96xf32>
    %11 = arith.addf %6, %10 : vector<192x96xf32>
    %12 = vector.extract_strided_slice %1 {offsets = [16, 0], sizes = [192, 28], strides = [1, 1]} : vector<224x28xf32> to vector<192x28xf32>
    %13 = vector.extract_strided_slice %2 {offsets = [2, 0, 0], sizes = [1, 28, 96], strides = [1, 1, 1]} : vector<5x28x96xf32> to vector<1x28x96xf32>
    %14 = vector.shape_cast %13 : vector<1x28x96xf32> to vector<28x96xf32>
    %cst_6 = arith.constant dense<0.000000e+00> : vector<192x96xf32>
    %15 = tpu.matmul %12, %14, %cst_6 {dimension_numbers = #tpu.dot_dimension_numbers<[1], [0], [0], [1], [0, 0, 1, 1], [], []>} : vector<192x28xf32>, vector<28x96xf32>, vector<192x96xf32> -> vector<192x96xf32>
    %16 = arith.addf %11, %15 : vector<192x96xf32>
    %17 = vector.extract_strided_slice %1 {offsets = [24, 0], sizes = [192, 28], strides = [1, 1]} : vector<224x28xf32> to vector<192x28xf32>
    %18 = vector.extract_strided_slice %2 {offsets = [3, 0, 0], sizes = [1, 28, 96], strides = [1, 1, 1]} : vector<5x28x96xf32> to vector<1x28x96xf32>
    %19 = vector.shape_cast %18 : vector<1x28x96xf32> to vector<28x96xf32>
    %cst_7 = arith.constant dense<0.000000e+00> : vector<192x96xf32>
    %20 = tpu.matmul %17, %19, %cst_7 {dimension_numbers = #tpu.dot_dimension_numbers<[1], [0], [0], [1], [0, 0, 1, 1], [], []>} : vector<192x28xf32>, vector<28x96xf32>, vector<192x96xf32> -> vector<192x96xf32>
    %21 = arith.addf %16, %20 : vector<192x96xf32>
    %22 = vector.extract_strided_slice %1 {offsets = [32, 0], sizes = [192, 28], strides = [1, 1]} : vector<224x28xf32> to vector<192x28xf32>
    %23 = vector.extract_strided_slice %2 {offsets = [4, 0, 0], sizes = [1, 28, 96], strides = [1, 1, 1]} : vector<5x28x96xf32> to vector<1x28x96xf32>
    %24 = vector.shape_cast %23 : vector<1x28x96xf32> to vector<28x96xf32>
    %cst_8 = arith.constant dense<0.000000e+00> : vector<192x96xf32>
    %25 = tpu.matmul %22, %24, %cst_8 {dimension_numbers = #tpu.dot_dimension_numbers<[1], [0], [0], [1], [0, 0, 1, 1], [], []>} : vector<192x28xf32>, vector<28x96xf32>, vector<192x96xf32> -> vector<192x96xf32>
    %26 = arith.addf %21, %25 : vector<192x96xf32>
    %c0_9 = arith.constant 0 : index
    %c0_10 = arith.constant 0 : index
    %27 = vector.load %arg3[%c0_9, %c0_10] : memref<1x96xf32, #tpu.memory_space<vmem>>, vector<1x96xf32>
    %28 = vector.broadcast %27 : vector<1x96xf32> to vector<192x96xf32>
    %29 = arith.addf %26, %28 : vector<192x96xf32>
    %cst_11 = arith.constant 0.000000e+00 : f32
    %30 = vector.broadcast %cst_11 : f32 to vector<192x96xf32>
    %31 = arith.maximumf %29, %30 : vector<192x96xf32>
    %32 = vector.extract_strided_slice %31 {offsets = [0, 0], sizes = [192, 92], strides = [1, 1]} : vector<192x96xf32> to vector<192x92xf32>
    %33 = vector.extract_strided_slice %31 {offsets = [0, 4], sizes = [192, 92], strides = [1, 1]} : vector<192x96xf32> to vector<192x92xf32>
    %34 = arith.maximumf %32, %33 : vector<192x92xf32>
    %35 = vector.shape_cast %34 : vector<192x92xf32> to vector<12x2x8x92xf32>
    %36 = vector.extract_strided_slice %35 {offsets = [0, 0, 0, 0], sizes = [12, 1, 8, 92], strides = [1, 1, 1, 1]} : vector<12x2x8x92xf32> to vector<12x1x8x92xf32>
    %37 = vector.shape_cast %36 : vector<12x1x8x92xf32> to vector<12x8x92xf32>
    %38 = vector.extract_strided_slice %35 {offsets = [0, 1, 0, 0], sizes = [12, 1, 8, 92], strides = [1, 1, 1, 1]} : vector<12x2x8x92xf32> to vector<12x1x8x92xf32>
    %39 = vector.shape_cast %38 : vector<12x1x8x92xf32> to vector<12x8x92xf32>
    %40 = arith.maximumf %37, %39 : vector<12x8x92xf32>
    %41 = vector.shape_cast %40 : vector<12x8x92xf32> to vector<96x92xf32>
    %c0_12 = arith.constant 0 : index
    %c0_13 = arith.constant 0 : index
    %c0_14 = arith.constant 0 : index
    %42 = vector.load %arg4[%c0_12, %c0_13, %c0_14] : memref<5x92x96xf32, #tpu.memory_space<vmem>>, vector<5x92x96xf32>
    %43 = vector.extract_strided_slice %41 {offsets = [0, 0], sizes = [64, 92], strides = [1, 1]} : vector<96x92xf32> to vector<64x92xf32>
    %44 = vector.extract_strided_slice %42 {offsets = [0, 0, 0], sizes = [1, 92, 96], strides = [1, 1, 1]} : vector<5x92x96xf32> to vector<1x92x96xf32>
    %45 = vector.shape_cast %44 : vector<1x92x96xf32> to vector<92x96xf32>
    %cst_15 = arith.constant dense<0.000000e+00> : vector<64x96xf32>
    %46 = tpu.matmul %43, %45, %cst_15 {dimension_numbers = #tpu.dot_dimension_numbers<[1], [0], [0], [1], [0, 0, 1, 1], [], []>} : vector<64x92xf32>, vector<92x96xf32>, vector<64x96xf32> -> vector<64x96xf32>
    %47 = vector.extract_strided_slice %41 {offsets = [8, 0], sizes = [64, 92], strides = [1, 1]} : vector<96x92xf32> to vector<64x92xf32>
    %48 = vector.extract_strided_slice %42 {offsets = [1, 0, 0], sizes = [1, 92, 96], strides = [1, 1, 1]} : vector<5x92x96xf32> to vector<1x92x96xf32>
    %49 = vector.shape_cast %48 : vector<1x92x96xf32> to vector<92x96xf32>
    %cst_16 = arith.constant dense<0.000000e+00> : vector<64x96xf32>
    %50 = tpu.matmul %47, %49, %cst_16 {dimension_numbers = #tpu.dot_dimension_numbers<[1], [0], [0], [1], [0, 0, 1, 1], [], []>} : vector<64x92xf32>, vector<92x96xf32>, vector<64x96xf32> -> vector<64x96xf32>
    %51 = arith.addf %46, %50 : vector<64x96xf32>
    %52 = vector.extract_strided_slice %41 {offsets = [16, 0], sizes = [64, 92], strides = [1, 1]} : vector<96x92xf32> to vector<64x92xf32>
    %53 = vector.extract_strided_slice %42 {offsets = [2, 0, 0], sizes = [1, 92, 96], strides = [1, 1, 1]} : vector<5x92x96xf32> to vector<1x92x96xf32>
    %54 = vector.shape_cast %53 : vector<1x92x96xf32> to vector<92x96xf32>
    %cst_17 = arith.constant dense<0.000000e+00> : vector<64x96xf32>
    %55 = tpu.matmul %52, %54, %cst_17 {dimension_numbers = #tpu.dot_dimension_numbers<[1], [0], [0], [1], [0, 0, 1, 1], [], []>} : vector<64x92xf32>, vector<92x96xf32>, vector<64x96xf32> -> vector<64x96xf32>
    %56 = arith.addf %51, %55 : vector<64x96xf32>
    %57 = vector.extract_strided_slice %41 {offsets = [24, 0], sizes = [64, 92], strides = [1, 1]} : vector<96x92xf32> to vector<64x92xf32>
    %58 = vector.extract_strided_slice %42 {offsets = [3, 0, 0], sizes = [1, 92, 96], strides = [1, 1, 1]} : vector<5x92x96xf32> to vector<1x92x96xf32>
    %59 = vector.shape_cast %58 : vector<1x92x96xf32> to vector<92x96xf32>
    %cst_18 = arith.constant dense<0.000000e+00> : vector<64x96xf32>
    %60 = tpu.matmul %57, %59, %cst_18 {dimension_numbers = #tpu.dot_dimension_numbers<[1], [0], [0], [1], [0, 0, 1, 1], [], []>} : vector<64x92xf32>, vector<92x96xf32>, vector<64x96xf32> -> vector<64x96xf32>
    %61 = arith.addf %56, %60 : vector<64x96xf32>
    %62 = vector.extract_strided_slice %41 {offsets = [32, 0], sizes = [64, 92], strides = [1, 1]} : vector<96x92xf32> to vector<64x92xf32>
    %63 = vector.extract_strided_slice %42 {offsets = [4, 0, 0], sizes = [1, 92, 96], strides = [1, 1, 1]} : vector<5x92x96xf32> to vector<1x92x96xf32>
    %64 = vector.shape_cast %63 : vector<1x92x96xf32> to vector<92x96xf32>
    %cst_19 = arith.constant dense<0.000000e+00> : vector<64x96xf32>
    %65 = tpu.matmul %62, %64, %cst_19 {dimension_numbers = #tpu.dot_dimension_numbers<[1], [0], [0], [1], [0, 0, 1, 1], [], []>} : vector<64x92xf32>, vector<92x96xf32>, vector<64x96xf32> -> vector<64x96xf32>
    %66 = arith.addf %61, %65 : vector<64x96xf32>
    %c0_20 = arith.constant 0 : index
    %c0_21 = arith.constant 0 : index
    %67 = vector.load %arg5[%c0_20, %c0_21] : memref<1x96xf32, #tpu.memory_space<vmem>>, vector<1x96xf32>
    %68 = vector.broadcast %67 : vector<1x96xf32> to vector<64x96xf32>
    %69 = arith.addf %66, %68 : vector<64x96xf32>
    %cst_22 = arith.constant 0.000000e+00 : f32
    %70 = vector.broadcast %cst_22 : f32 to vector<64x96xf32>
    %71 = arith.maximumf %69, %70 : vector<64x96xf32>
    %72 = vector.extract_strided_slice %71 {offsets = [0, 0], sizes = [64, 84], strides = [1, 1]} : vector<64x96xf32> to vector<64x84xf32>
    %73 = vector.extract_strided_slice %71 {offsets = [0, 12], sizes = [64, 84], strides = [1, 1]} : vector<64x96xf32> to vector<64x84xf32>
    %74 = arith.maximumf %72, %73 : vector<64x84xf32>
    %75 = vector.shape_cast %74 : vector<64x84xf32> to vector<4x2x8x84xf32>
    %76 = vector.extract_strided_slice %75 {offsets = [0, 0, 0, 0], sizes = [4, 1, 8, 84], strides = [1, 1, 1, 1]} : vector<4x2x8x84xf32> to vector<4x1x8x84xf32>
    %77 = vector.shape_cast %76 : vector<4x1x8x84xf32> to vector<4x8x84xf32>
    %78 = vector.extract_strided_slice %75 {offsets = [0, 1, 0, 0], sizes = [4, 1, 8, 84], strides = [1, 1, 1, 1]} : vector<4x2x8x84xf32> to vector<4x1x8x84xf32>
    %79 = vector.shape_cast %78 : vector<4x1x8x84xf32> to vector<4x8x84xf32>
    %80 = arith.maximumf %77, %79 : vector<4x8x84xf32>
    %c0_23 = arith.constant 0 : index
    %c0_24 = arith.constant 0 : index
    %c0_25 = arith.constant 0 : index
    %81 = vector.load %arg6[%c0_23, %c0_24, %c0_25] : memref<4x84x120xf32, #tpu.memory_space<vmem>>, vector<4x84x120xf32>
    %82 = vector.extract_strided_slice %80 {offsets = [0, 0, 0], sizes = [1, 8, 84], strides = [1, 1, 1]} : vector<4x8x84xf32> to vector<1x8x84xf32>
    %83 = vector.shape_cast %82 : vector<1x8x84xf32> to vector<8x84xf32>
    %84 = vector.extract_strided_slice %81 {offsets = [0, 0, 0], sizes = [1, 84, 120], strides = [1, 1, 1]} : vector<4x84x120xf32> to vector<1x84x120xf32>
    %85 = vector.shape_cast %84 : vector<1x84x120xf32> to vector<84x120xf32>
    %cst_26 = arith.constant dense<0.000000e+00> : vector<8x120xf32>
    %86 = tpu.matmul %83, %85, %cst_26 {dimension_numbers = #tpu.dot_dimension_numbers<[1], [0], [0], [1], [0, 0, 1, 1], [], []>} : vector<8x84xf32>, vector<84x120xf32>, vector<8x120xf32> -> vector<8x120xf32>
    %87 = vector.extract_strided_slice %80 {offsets = [1, 0, 0], sizes = [1, 8, 84], strides = [1, 1, 1]} : vector<4x8x84xf32> to vector<1x8x84xf32>
    %88 = vector.shape_cast %87 : vector<1x8x84xf32> to vector<8x84xf32>
    %89 = vector.extract_strided_slice %81 {offsets = [1, 0, 0], sizes = [1, 84, 120], strides = [1, 1, 1]} : vector<4x84x120xf32> to vector<1x84x120xf32>
    %90 = vector.shape_cast %89 : vector<1x84x120xf32> to vector<84x120xf32>
    %cst_27 = arith.constant dense<0.000000e+00> : vector<8x120xf32>
    %91 = tpu.matmul %88, %90, %cst_27 {dimension_numbers = #tpu.dot_dimension_numbers<[1], [0], [0], [1], [0, 0, 1, 1], [], []>} : vector<8x84xf32>, vector<84x120xf32>, vector<8x120xf32> -> vector<8x120xf32>
    %92 = arith.addf %86, %91 : vector<8x120xf32>
    %93 = vector.extract_strided_slice %80 {offsets = [2, 0, 0], sizes = [1, 8, 84], strides = [1, 1, 1]} : vector<4x8x84xf32> to vector<1x8x84xf32>
    %94 = vector.shape_cast %93 : vector<1x8x84xf32> to vector<8x84xf32>
    %95 = vector.extract_strided_slice %81 {offsets = [2, 0, 0], sizes = [1, 84, 120], strides = [1, 1, 1]} : vector<4x84x120xf32> to vector<1x84x120xf32>
    %96 = vector.shape_cast %95 : vector<1x84x120xf32> to vector<84x120xf32>
    %cst_28 = arith.constant dense<0.000000e+00> : vector<8x120xf32>
    %97 = tpu.matmul %94, %96, %cst_28 {dimension_numbers = #tpu.dot_dimension_numbers<[1], [0], [0], [1], [0, 0, 1, 1], [], []>} : vector<8x84xf32>, vector<84x120xf32>, vector<8x120xf32> -> vector<8x120xf32>
    %98 = arith.addf %92, %97 : vector<8x120xf32>
    %99 = vector.extract_strided_slice %80 {offsets = [3, 0, 0], sizes = [1, 8, 84], strides = [1, 1, 1]} : vector<4x8x84xf32> to vector<1x8x84xf32>
    %100 = vector.shape_cast %99 : vector<1x8x84xf32> to vector<8x84xf32>
    %101 = vector.extract_strided_slice %81 {offsets = [3, 0, 0], sizes = [1, 84, 120], strides = [1, 1, 1]} : vector<4x84x120xf32> to vector<1x84x120xf32>
    %102 = vector.shape_cast %101 : vector<1x84x120xf32> to vector<84x120xf32>
    %cst_29 = arith.constant dense<0.000000e+00> : vector<8x120xf32>
    %103 = tpu.matmul %100, %102, %cst_29 {dimension_numbers = #tpu.dot_dimension_numbers<[1], [0], [0], [1], [0, 0, 1, 1], [], []>} : vector<8x84xf32>, vector<84x120xf32>, vector<8x120xf32> -> vector<8x120xf32>
    %104 = arith.addf %98, %103 : vector<8x120xf32>
    %c0_30 = arith.constant 0 : index
    %c0_31 = arith.constant 0 : index
    %105 = vector.load %arg7[%c0_30, %c0_31] : memref<1x120xf32, #tpu.memory_space<vmem>>, vector<1x120xf32>
    %106 = vector.broadcast %105 : vector<1x120xf32> to vector<8x120xf32>
    %107 = arith.addf %104, %106 : vector<8x120xf32>
    %cst_32 = arith.constant 0.000000e+00 : f32
    %108 = vector.broadcast %cst_32 : f32 to vector<8x120xf32>
    %109 = arith.maximumf %107, %108 : vector<8x120xf32>
    %c0_33 = arith.constant 0 : index
    %c0_34 = arith.constant 0 : index
    %110 = vector.load %arg8[%c0_33, %c0_34] : memref<120x100xf32, #tpu.memory_space<vmem>>, vector<120x100xf32>
    %cst_35 = arith.constant dense<0.000000e+00> : vector<8x100xf32>
    %111 = tpu.matmul %109, %110, %cst_35 {dimension_numbers = #tpu.dot_dimension_numbers<[1], [0], [0], [1], [0, 0, 1, 1], [], []>} : vector<8x120xf32>, vector<120x100xf32>, vector<8x100xf32> -> vector<8x100xf32>
    %c0_36 = arith.constant 0 : index
    %c0_37 = arith.constant 0 : index
    %112 = vector.load %arg9[%c0_36, %c0_37] : memref<1x100xf32, #tpu.memory_space<vmem>>, vector<1x100xf32>
    %113 = vector.broadcast %112 : vector<1x100xf32> to vector<8x100xf32>
    %114 = arith.addf %111, %113 : vector<8x100xf32>
    %cst_38 = arith.constant 0.000000e+00 : f32
    %115 = vector.broadcast %cst_38 : f32 to vector<8x100xf32>
    %116 = arith.maximumf %114, %115 : vector<8x100xf32>
    %c0_39 = arith.constant 0 : index
    %c0_40 = arith.constant 0 : index
    %117 = vector.load %arg10[%c0_39, %c0_40] : memref<100x128xf32, #tpu.memory_space<vmem>>, vector<100x128xf32>
    %cst_41 = arith.constant dense<0.000000e+00> : vector<8x128xf32>
    %118 = tpu.matmul %116, %117, %cst_41 {dimension_numbers = #tpu.dot_dimension_numbers<[1], [0], [0], [1], [0, 0, 1, 1], [], []>} : vector<8x100xf32>, vector<100x128xf32>, vector<8x128xf32> -> vector<8x128xf32>
    %c0_42 = arith.constant 0 : index
    %c0_43 = arith.constant 0 : index
    %119 = vector.load %arg11[%c0_42, %c0_43] : memref<1x128xf32, #tpu.memory_space<vmem>>, vector<1x128xf32>
    %120 = vector.broadcast %119 : vector<1x128xf32> to vector<8x128xf32>
    %121 = arith.addf %118, %120 : vector<8x128xf32>
    %cst_44 = arith.constant dense<0xFF800000> : vector<8xf32>
    %122 = vector.multi_reduction <maximumf>, %121, %cst_44 [1] : vector<8x128xf32> to vector<8xf32>
    %123 = vector.shape_cast %122 : vector<8xf32> to vector<8x1xf32>
    %124 = vector.broadcast %123 : vector<8x1xf32> to vector<8x128xf32>
    %125 = arith.subf %121, %124 : vector<8x128xf32>
    %126 = math.exp %125 : vector<8x128xf32>
    %cst_45 = arith.constant dense<0.000000e+00> : vector<8xf32>
    %127 = vector.multi_reduction <add>, %126, %cst_45 [1] : vector<8x128xf32> to vector<8xf32>
    %128 = vector.shape_cast %127 : vector<8xf32> to vector<8x1xf32>
    %129 = math.log %128 : vector<8x1xf32>
    %130 = vector.broadcast %129 : vector<8x1xf32> to vector<8x128xf32>
    %131 = arith.subf %125, %130 : vector<8x128xf32>
    %c0_46 = arith.constant 0 : index
    %c0_47 = arith.constant 0 : index
    %132 = vector.load %arg12[%c0_46, %c0_47] : memref<8x128xf32, #tpu.memory_space<vmem>>, vector<8x128xf32>
    tpu.vector_store %arg12[%c0_46, %c0_47], %131 {strides = array<i32>} : memref<8x128xf32, #tpu.memory_space<vmem>>, vector<8x128xf32>,
    return
  }
  func.func @transform_0(%arg0: i32) -> (i32, i32, i32) {
    %c0_i32 = arith.constant 0 : i32
    %c0_i32_0 = arith.constant 0 : i32
    %c0_i32_1 = arith.constant 0 : i32
    return %c0_i32, %arg0, %c0_i32_0 : i32, i32, i32
  }
  func.func @transform_1(%arg0: i32) -> (i32, i32, i32) {
    %c0_i32 = arith.constant 0 : i32
    %c0_i32_0 = arith.constant 0 : i32
    %c0_i32_1 = arith.constant 0 : i32
    %c0_i32_2 = arith.constant 0 : i32
    return %c0_i32, %c0_i32_0, %c0_i32_1 : i32, i32, i32
  }
  func.func @transform_2(%arg0: i32) -> (i32, i32) {
    %c0_i32 = arith.constant 0 : i32
    %c0_i32_0 = arith.constant 0 : i32
    %c0_i32_1 = arith.constant 0 : i32
    return %c0_i32, %c0_i32_0 : i32, i32
  }
  func.func @transform_3(%arg0: i32) -> (i32, i32, i32) {
    %c0_i32 = arith.constant 0 : i32
    %c0_i32_0 = arith.constant 0 : i32
    %c0_i32_1 = arith.constant 0 : i32
    %c0_i32_2 = arith.constant 0 : i32
    return %c0_i32, %c0_i32_0, %c0_i32_1 : i32, i32, i32
  }
  func.func @transform_4(%arg0: i32) -> (i32, i32) {
    %c0_i32 = arith.constant 0 : i32
    %c0_i32_0 = arith.constant 0 : i32
    %c0_i32_1 = arith.constant 0 : i32
    return %c0_i32, %c0_i32_0 : i32, i32
  }
  func.func @transform_5(%arg0: i32) -> (i32, i32, i32) {
    %c0_i32 = arith.constant 0 : i32
    %c0_i32_0 = arith.constant 0 : i32
    %c0_i32_1 = arith.constant 0 : i32
    %c0_i32_2 = arith.constant 0 : i32
    return %c0_i32, %c0_i32_0, %c0_i32_1 : i32, i32, i32
  }
  func.func @transform_6(%arg0: i32) -> (i32, i32) {
    %c0_i32 = arith.constant 0 : i32
    %c0_i32_0 = arith.constant 0 : i32
    %c0_i32_1 = arith.constant 0 : i32
    return %c0_i32, %c0_i32_0 : i32, i32
  }
  func.func @transform_7(%arg0: i32) -> (i32, i32) {
    %c0_i32 = arith.constant 0 : i32
    %c0_i32_0 = arith.constant 0 : i32
    %c0_i32_1 = arith.constant 0 : i32
    return %c0_i32, %c0_i32_0 : i32, i32
  }
  func.func @transform_8(%arg0: i32) -> (i32, i32) {
    %c0_i32 = arith.constant 0 : i32
    %c0_i32_0 = arith.constant 0 : i32
    %c0_i32_1 = arith.constant 0 : i32
    return %c0_i32, %c0_i32_0 : i32, i32
  }
  func.func @transform_9(%arg0: i32) -> (i32, i32) {
    %c0_i32 = arith.constant 0 : i32
    %c0_i32_0 = arith.constant 0 : i32
    %c0_i32_1 = arith.constant 0 : i32
    return %c0_i32, %c0_i32_0 : i32, i32
  }
  func.func @transform_10(%arg0: i32) -> (i32, i32) {
    %c0_i32 = arith.constant 0 : i32
    %c0_i32_0 = arith.constant 0 : i32
    %c0_i32_1 = arith.constant 0 : i32
    return %c0_i32, %c0_i32_0 : i32, i32
  }
  func.func @transform_11(%arg0: i32) -> (i32, i32) {
    %c0_i32 = arith.constant 0 : i32
    %c0_i32_0 = arith.constant 0 : i32
    return %arg0, %c0_i32 : i32, i32
  }
}

</mosaic_0001>

<bundles_post_ra>
// kernel: tile.13
= control target key start
LH: loop header
LB: loop body
LE: loop exit
PB: predicated region body
PF: predicated region fallthrough
CT: control target
= control target key end

     0   :  { %s34_s0 = inlined_call_operand.vmem [shape: f32[4], index: 0, kind: input, shape index: {}]   ;;  %s35_s1 = inlined_call_operand.vmem [shape: f32[24,4], index: 1, kind: output, shape index: {}]  }
   0x1   :  { %v4_v0 = vld [vmem:[%s34_s0] ss:$0 sm:$0xff] }
   0x2   :  { %5 = vst [vmem:[%s35_s1] sm:$0xff] %v4_v0  ;;  %10 = vst [vmem:[%s35_s1 + $0x8] sm:$0xff] %v4_v0 }
   0x3   :  { %11 = vst [vmem:[%s35_s1 + $0x10] sm:$0xff] %v4_v0 }

// kernel: tile.14
= control target key start
LH: loop header
LB: loop body
LE: loop exit
PB: predicated region body
PF: predicated region fallthrough
CT: control target
= control target key end

     0   :  { %s197_s10 = smov 92   ;;  %s198_s11 = smov 84   ;;  %vm3_vm0 = vcmask 31744   ;;  %vm9_vm1 = vcmask 786144   ;;  %vm15_vm2 = vcmask 753344   ;;  %vm21_vm3 = vcmask 720544   ;;  %s305_s0 = inlined_call_operand.vmem [shape: f32[24,4], index: 0, kind: input, shape index: {}]   ;;  %s306_s1 = inlined_call_operand.vmem [shape: f32[1,96], index: 1, kind: output, shape index: {}]  }
   0x1   :  { %v151_v0 = vld [vmem:[%s305_s0 + $0x17] sm:$0x1]   ;;  %v153_v1 = vld [vmem:[%s305_s0 + $0x15] sm:$0x1]   ;;  %v152_v2 = vld [vmem:[%s305_s0 + $0x16] sm:$0x1]  }
   0x2   :  { %7 = vrot.lane.b32.xlu0 %v151_v0, %s197_s10  ;;  %19 = vrot.lane.b32.xlu1 %v153_v1, %s198_s11  ;;  %v154_v3 = vld [vmem:[%s305_s0 + $0x14] sm:$0x1]   ;;  %s199_s16 = smov 88   ;;  %s200_s17 = smov 80   ;;  %v155_v4 = vld [vmem:[%s305_s0 + $0x13] sm:$0x1]  }
   0x3   :  { %v156_v5 = vld [vmem:[%s305_s0 + $0x12] sm:$0x1]   ;;  %s201_s22 = smov 76   ;;  %s202_s23 = smov 72   ;;  %v157_v6 = vld [vmem:[%s305_s0 + $0x11] sm:$0x1]  }
   0x4   :  { %v158_v7 = vld [vmem:[%s305_s0 + $0x10] sm:$0x1]   ;;  %v2_v8 = vld [vmem:[%s305_s0] sm:$0x1]   ;;  %s203_s30 = smov 68   ;;  %s204_s2 = smov 64  }
   0x5   :  { %4 = vst.msk [vmem:[#allocation0] sm:$0x1] %vm3_vm0, %v2_v8   ;;  %v159_v9 = vld [vmem:[%s305_s0 + $0xf] sm:$0x1]   ;;  %v160_v10 = vld [vmem:[%s305_s0 + $0xe] sm:$0x1]  }
   0x6   :  { %13 = vrot.lane.b32.xlu0 %v152_v2, %s199_s16  ;;  %25 = vrot.lane.b32.xlu1 %v154_v3, %s200_s17  ;;  %s205_s7 = smov 60   ;;  %s206_s8 = smov 56   ;;  %v161_v11 = vld [vmem:[%s305_s0 + $0xd] sm:$0x1]   ;;  %v162_v12 = vld [vmem:[%s305_s0 + $0xc] sm:$0x1]  }
   0x7   :  { %s207_s13 = smov 52   ;;  %s208_s14 = smov 48   ;;  %v163_v13 = vld [vmem:[%s305_s0 + $0xb] sm:$0x1]   ;;  %v164_v14 = vld [vmem:[%s305_s0 + $0xa] sm:$0x1]  }
   0x8   :  { %s209_s19 = smov 44   ;;  %s210_s20 = smov 40   ;;  %v165_v15 = vld [vmem:[%s305_s0 + $0x9] sm:$0x1]   ;;  %v166_v16 = vld [vmem:[%s305_s0 + $0x8] sm:$0x1]  }
   0x9   :  { %s211_s25 = smov 36   ;;  %s212_s26 = smov 32   ;;  %v167_v17 = vld [vmem:[%s305_s0 + $0x7] sm:$0x1]   ;;  %v168_v18 = vld [vmem:[%s305_s0 + $0x6] sm:$0x1]  }
   0xa   :  { %31 = vrot.lane.b32.xlu0 %v155_v4, %s201_s22  ;;  %37 = vrot.lane.b32.xlu1 %v156_v5, %s202_s23  ;;  %s214_s3 = smov 24   ;;  %v169_v19 = vld [vmem:[%s305_s0 + $0x5] sm:$0x1]   ;;  %v170_v20 = vld [vmem:[%s305_s0 + $0x4] sm:$0x1]   ;;  %s216_s9 = smov 16  }
   0xb   :  { %v171_v21 = vld [vmem:[%s305_s0 + $0x3] sm:$0x1]   ;;  %v172_v22 = vld [vmem:[%s305_s0 + $0x2] sm:$0x1]   ;;  %s218_s15 = smov 8   ;;  %vm27_vm4 = vcmask 687744  }
   0xc   :  { %v173_v23 = vld [vmem:[%s305_s0 + $0x1] sm:$0x1]   ;;  %s219_s0 = smov 4   ;;  %vm33_vm5 = vcmask 654944   ;;  %vm39_vm6 = vcmask 622144   ;;  %vm45_vm7 = vcmask 589344  }
   0xd   :  { %vm51_vm8 = vcmask 556544   ;;  %vm57_vm9 = vcmask 523744   ;;  %vm63_vm10 = vcmask 490944   ;;  %vm69_vm11 = vcmask 458144  }
   0xe   :  { %43 = vrot.lane.b32.xlu0 %v157_v6, %s203_s30  ;;  %49 = vrot.lane.b32.xlu1 %v158_v7, %s204_s2  ;;  %s213_s2 = smov 28   ;;  %vm75_vm12 = vcmask 425344   ;;  %vm81_vm13 = vcmask 392544   ;;  %vm87_vm14 = vcmask 359744   ;;  %vm93_vm15 = vcmask 326944  }
   0xf   :  { %vm99_vm0 = vcmask 294144  }
  0x12   :  { %55 = vrot.lane.b32.xlu0 %v159_v9, %s205_s7  ;;  %61 = vrot.lane.b32.xlu1 %v160_v10, %s206_s8  ;;  %s215_s8 = smov 20  }
  0x16   :  { %67 = vrot.lane.b32.xlu0 %v161_v11, %s207_s13  ;;  %73 = vrot.lane.b32.xlu1 %v162_v12, %s208_s14  ;;  %s217_s14 = smov 12  }
  0x1a   :  { %79 = vrot.lane.b32.xlu0 %v163_v13, %s209_s19  ;;  %85 = vrot.lane.b32.xlu1 %v164_v14, %s210_s20 }
  0x1e   :  { %91 = vrot.lane.b32.xlu0 %v165_v15, %s211_s25  ;;  %97 = vrot.lane.b32.xlu1 %v166_v16, %s212_s26 }
  0x22   :  { %103 = vrot.lane.b32.xlu0 %v167_v17, %s213_s2  ;;  %109 = vrot.lane.b32.xlu1 %v168_v18, %s214_s3 }
  0x26   :  { %115 = vrot.lane.b32.xlu0 %v169_v19, %s215_s8  ;;  %121 = vrot.lane.b32.xlu1 %v170_v20, %s216_s9 }
  0x2a   :  { %127 = vrot.lane.b32.xlu0 %v171_v21, %s217_s14  ;;  %133 = vrot.lane.b32.xlu1 %v172_v22, %s218_s15 }
  0x2e   :  { %139 = vrot.lane.b32.xlu0 %v173_v23, %s219_s0 }
  0x74   :  { %v8_v24 = vpop.permute.xlu0 %7   ;;  %v20_v25 = vpop.permute.xlu1 %19  }
  0x75   :  { %10 = vst.msk [vmem:[#allocation0] sm:$0x1] %vm9_vm1, %v8_v24   ;;  %vm105_vm1 = vcmask 261344  }
  0x78   :  { %v14_v26 = vpop.permute.xlu0 %13   ;;  %v26_v27 = vpop.permute.xlu1 %25  }
  0x79   :  { %16 = vst.msk [vmem:[#allocation0] sm:$0x1] %vm15_vm2, %v14_v26   ;;  %vm111_vm2 = vcmask 228544  }
  0x7a   :  { %22 = vst.msk [vmem:[#allocation0] sm:$0x1] %vm21_vm3, %v20_v25   ;;  %vm117_vm3 = vcmask 195744  }
  0x7b   :  { %28 = vst.msk [vmem:[#allocation0] sm:$0x1] %vm27_vm4, %v26_v27   ;;  %vm123_vm4 = vcmask 162944  }
  0x7c   :  { %v32_v28 = vpop.permute.xlu0 %31   ;;  %v38_v29 = vpop.permute.xlu1 %37  }
  0x7d   :  { %34 = vst.msk [vmem:[#allocation0] sm:$0x1] %vm33_vm5, %v32_v28   ;;  %vm129_vm5 = vcmask 130144  }
  0x7e   :  { %40 = vst.msk [vmem:[#allocation0] sm:$0x1] %vm39_vm6, %v38_v29   ;;  %vm135_vm6 = vcmask 97344  }
  0x80   :  { %v44_v30 = vpop.permute.xlu0 %43   ;;  %v50_v31 = vpop.permute.xlu1 %49  }
  0x81   :  { %46 = vst.msk [vmem:[#allocation0] sm:$0x1] %vm45_vm7, %v44_v30   ;;  %vm141_vm7 = vcmask 64544  }
  0x82   :  { %52 = vst.msk [vmem:[#allocation0] sm:$0x1] %vm51_vm8, %v50_v31  }
  0x84   :  { %v56_v32 = vpop.permute.xlu0 %55   ;;  %v62_v33 = vpop.permute.xlu1 %61  }
  0x85   :  { %58 = vst.msk [vmem:[#allocation0] sm:$0x1] %vm57_vm9, %v56_v32  }
  0x86   :  { %64 = vst.msk [vmem:[#allocation0] sm:$0x1] %vm63_vm10, %v62_v33  }
  0x88   :  { %v68_v34 = vpop.permute.xlu0 %67   ;;  %v74_v35 = vpop.permute.xlu1 %73  }
  0x89   :  { %70 = vst.msk [vmem:[#allocation0] sm:$0x1] %vm69_vm11, %v68_v34  }
  0x8a   :  { %76 = vst.msk [vmem:[#allocation0] sm:$0x1] %vm75_vm12, %v74_v35  }
  0x8c   :  { %v80_v36 = vpop.permute.xlu0 %79   ;;  %v86_v37 = vpop.permute.xlu1 %85  }
  0x8d   :  { %82 = vst.msk [vmem:[#allocation0] sm:$0x1] %vm81_vm13, %v80_v36  }
  0x8e   :  { %88 = vst.msk [vmem:[#allocation0] sm:$0x1] %vm87_vm14, %v86_v37  }
  0x90   :  { %v92_v38 = vpop.permute.xlu0 %91   ;;  %v98_v39 = vpop.permute.xlu1 %97  }
  0x91   :  { %94 = vst.msk [vmem:[#allocation0] sm:$0x1] %vm93_vm15, %v92_v38  }
  0x92   :  { %100 = vst.msk [vmem:[#allocation0] sm:$0x1] %vm99_vm0, %v98_v39  }
  0x94   :  { %v104_v40 = vpop.permute.xlu0 %103   ;;  %v110_v41 = vpop.permute.xlu1 %109  }
  0x95   :  { %106 = vst.msk [vmem:[#allocation0] sm:$0x1] %vm105_vm1, %v104_v40  }
  0x96   :  { %112 = vst.msk [vmem:[#allocation0] sm:$0x1] %vm111_vm2, %v110_v41  }
  0x98   :  { %v116_v42 = vpop.permute.xlu0 %115   ;;  %v122_v43 = vpop.permute.xlu1 %121  }
  0x99   :  { %118 = vst.msk [vmem:[#allocation0] sm:$0x1] %vm117_vm3, %v116_v42  }
  0x9a   :  { %124 = vst.msk [vmem:[#allocation0] sm:$0x1] %vm123_vm4, %v122_v43  }
  0x9c   :  { %v128_v44 = vpop.permute.xlu0 %127   ;;  %v134_v45 = vpop.permute.xlu1 %133  }
  0x9d   :  { %130 = vst.msk [vmem:[#allocation0] sm:$0x1] %vm129_vm5, %v128_v44  }
  0x9e   :  { %136 = vst.msk [vmem:[#allocation0] sm:$0x1] %vm135_vm6, %v134_v45  }
  0xa0   :  { %v140_v46 = vpop.permute.xlu0 %139  }
  0xa1   :  { %142 = vst.msk [vmem:[#allocation0] sm:$0x1] %vm141_vm7, %v140_v46  }
  0xa8   :  { %v147_v47 = vld [vmem:[#allocation0] sm:$0x1] }
  0xa9   :  { %150 = vst [vmem:[%s306_s1] sm:$0x1] %v147_v47 }

// kernel: tile.18
= control target key start
LH: loop header
LB: loop body
LE: loop exit
PB: predicated region body
PF: predicated region fallthrough
CT: control target
= control target key end

     0   :  { %s22_s0 = inlined_call_operand.vmem [shape: f32[12], index: 0, kind: input, shape index: {}]   ;;  %s23_s1 = inlined_call_operand.vmem [shape: f32[8,12], index: 1, kind: output, shape index: {}]  }
   0x1   :  { %v4_v0 = vld [vmem:[%s22_s0] ss:$0 sm:$0xff] }
   0x2   :  { %5 = vst [vmem:[%s23_s1] sm:$0xff] %v4_v0 }

// kernel: tile.19
= control target key start
LH: loop header
LB: loop body
LE: loop exit
PB: predicated region body
PF: predicated region fallthrough
CT: control target
= control target key end

     0   :  { %s69_s10 = smov 84   ;;  %s70_s11 = smov 60   ;;  %vm3_vm0 = vcmask 97280   ;;  %vm9_vm1 = vcmask 786080   ;;  %vm15_vm2 = vcmask 687680   ;;  %vm21_vm3 = vcmask 589280   ;;  %s113_s0 = inlined_call_operand.vmem [shape: f32[8,12], index: 0, kind: input, shape index: {}]   ;;  %s114_s1 = inlined_call_operand.vmem [shape: f32[1,96], index: 1, kind: output, shape index: {}]  }
   0x1   :  { %v55_v0 = vld [vmem:[%s113_s0 + $0x7] sm:$0x1]   ;;  %v57_v1 = vld [vmem:[%s113_s0 + $0x5] sm:$0x1]   ;;  %v56_v2 = vld [vmem:[%s113_s0 + $0x6] sm:$0x1]  }
   0x2   :  { %7 = vrot.lane.b32.xlu0 %v55_v0, %s69_s10  ;;  %19 = vrot.lane.b32.xlu1 %v57_v1, %s70_s11  ;;  %v58_v3 = vld [vmem:[%s113_s0 + $0x4] sm:$0x1]   ;;  %v2_v4 = vld [vmem:[%s113_s0] sm:$0x1]   ;;  %s71_s18 = smov 72   ;;  %s72_s19 = smov 48  }
   0x3   :  { %4 = vst.msk [vmem:[#allocation0] sm:$0x1] %vm3_vm0, %v2_v4   ;;  %v59_v5 = vld [vmem:[%s113_s0 + $0x3] sm:$0x1]   ;;  %v60_v6 = vld [vmem:[%s113_s0 + $0x2] sm:$0x1]  }
   0x4   :  { %s73_s24 = smov 36   ;;  %s74_s25 = smov 24   ;;  %v61_v7 = vld [vmem:[%s113_s0 + $0x1] sm:$0x1]   ;;  %vm27_vm4 = vcmask 490880   ;;  %vm33_vm5 = vcmask 392480  }
   0x5   :  { %s75_s0 = smov 12   ;;  %vm39_vm6 = vcmask 294080   ;;  %vm45_vm7 = vcmask 195680  }
   0x6   :  { %13 = vrot.lane.b32.xlu0 %v56_v2, %s71_s18  ;;  %25 = vrot.lane.b32.xlu1 %v58_v3, %s72_s19 }
   0xa   :  { %31 = vrot.lane.b32.xlu0 %v59_v5, %s73_s24  ;;  %37 = vrot.lane.b32.xlu1 %v60_v6, %s74_s25 }
   0xe   :  { %43 = vrot.lane.b32.xlu0 %v61_v7, %s75_s0 }
  0x74   :  { %v8_v8 = vpop.permute.xlu0 %7   ;;  %v20_v9 = vpop.permute.xlu1 %19  }
  0x75   :  { %10 = vst.msk [vmem:[#allocation0] sm:$0x1] %vm9_vm1, %v8_v8  }
  0x78   :  { %v14_v10 = vpop.permute.xlu0 %13   ;;  %v26_v11 = vpop.permute.xlu1 %25  }
  0x79   :  { %16 = vst.msk [vmem:[#allocation0] sm:$0x1] %vm15_vm2, %v14_v10  }
  0x7a   :  { %22 = vst.msk [vmem:[#allocation0] sm:$0x1] %vm21_vm3, %v20_v9  }
  0x7b   :  { %28 = vst.msk [vmem:[#allocation0] sm:$0x1] %vm27_vm4, %v26_v11  }
  0x7c   :  { %v32_v12 = vpop.permute.xlu0 %31   ;;  %v38_v13 = vpop.permute.xlu1 %37  }
  0x7d   :  { %34 = vst.msk [vmem:[#allocation0] sm:$0x1] %vm33_vm5, %v32_v12  }
  0x7e   :  { %40 = vst.msk [vmem:[#allocation0] sm:$0x1] %vm39_vm6, %v38_v13  }
  0x80   :  { %v44_v14 = vpop.permute.xlu0 %43  }
  0x81   :  { %46 = vst.msk [vmem:[#allocation0] sm:$0x1] %vm45_vm7, %v44_v14  }
  0x88   :  { %v51_v15 = vld [vmem:[#allocation0] sm:$0x1] }
  0x89   :  { %54 = vst [vmem:[%s114_s1] sm:$0x1] %v51_v15 }

// kernel: cnn_femnist_forward.1
= control target key start
LH: loop header
LB: loop body
LE: loop exit
PB: predicated region body
PF: predicated region fallthrough
CT: control target
= control target key end

     0   :  { %vm159_vm0 = vcmask 1043456   ;;  %vm86_vm1 = vcmask 228352   ;;  %s3750_s21 = smov 124   ;;  %vm1431_vm2 = vcmask 752640   ;;  %vm3752_vm3 = vmmov 0   ;;  %s3753_s27 = smov 116   ;;  %s5370_s1 = inlined_call_operand.vmem [shape: f32[5,28,96], index: 1, kind: input, shape index: {}]   ;;  %s5371_s0 = inlined_call_operand.vmem [shape: f32[28,8,28], index: 0, kind: input, shape index: {}]   ;;  %s5372_s3 = inlined_call_operand.vmem [shape: f32[5,92,96], index: 3, kind: input, shape index: {}]   ;;  %s5373_s2 = inlined_call_operand.vmem [shape: f32[1,96], index: 2, kind: input, shape index: {}]   ;;  %s5374_s5 = inlined_call_operand.vmem [shape: f32[4,84,120], index: 5, kind: input, shape index: {}]   ;;  %s5375_s4 = inlined_call_operand.vmem [shape: f32[1,96], index: 4, kind: input, shape index: {}]   ;;  %s5376_s7 = inlined_call_operand.vmem [shape: f32[120,100], index: 7, kind: input, shape index: {}]   ;;  %s5377_s9 = inlined_call_operand.vmem [shape: f32[100,128], index: 9, kind: input, shape index: {}]   ;;  %s5378_s6 = inlined_call_operand.vmem [shape: f32[1,120], index: 6, kind: input, shape index: {}]   ;;  %s5379_s8 = inlined_call_operand.vmem [shape: f32[1,100], index: 8, kind: input, shape index: {}]   ;;  %s5380_s10 = inlined_call_operand.vmem [shape: f32[1,128], index: 10, kind: input, shape index: {}]   ;;  %s5381_s11 = inlined_call_operand.vmem [shape: f32[8,128], index: 11, kind: output, shape index: {}]  }
   0x1   :  { %v73_v0 = vld [vmem:[%s5370_s1 + $0x38] sm:$0xf]  ;;  %v72_v1 = vld [vmem:[%s5370_s1 + $0x30] sm:$0xff]  ;;  %v3824_v2 = vld [vmem:[%s5371_s0 + $0x8] sm:$0xff]  ;;  %vm2143_vm4 = vcmask 687104   ;;  %vm2481_vm5 = vcmask 982016  }
   0x2   :  { %3172 = vmatprep.subr.msk.mxu0 %vm159_vm0, %v73_v0  ;;  %v71_v3 = vld [vmem:[%s5370_s1 + $0x28] sm:$0xff]  ;;  %3180 = vmatprep.mubr.msk.f32.mxu0 %vm86_vm1, %v3824_v2  ;;  %v69_v4 = vld [vmem:[%s5370_s1 + $0x18] sm:$0xf]  ;;  %v68_v5 = vld [vmem:[%s5370_s1 + $0x10] sm:$0xff]  ;;  %vm2576_vm6 = vcmask 818176  }
   0x3   :  { %3173 = vmatpush3.msk.msra.mxu0 %vm159_vm0, %v73_v0  ;;  %3734 = vmatprep.subr.msk.mxu1 %vm159_vm0, %v69_v4  ;;  %v70_v6 = vld [vmem:[%s5370_s1 + $0x20] sm:$0xff]  ;;  %v67_v7 = vld [vmem:[%s5370_s1 + $0x8] sm:$0xff]  ;;  %v3849_v8 = vld [vmem:[%s5371_s0 + $0x10] sm:$0xff] }
   0x4   :  { %3174 = vmatprep.subr.mxu0 %v72_v1  ;;  %3738 = vmatpush3.msk.msra.mxu1 %vm159_vm0, %v69_v4  ;;  %v3854_v9 = vld [vmem:[%s5371_s0 + $0x18] sm:$0xff]  ;;  %v66_v10 = vld [vmem:[%s5370_s1] sm:$0xff]  ;;  %v3873_v12 = vld [vmem:[%s5371_s0 + $0x28] sm:$0xff] }
   0x5   :  { %3175 = vmatpush3.msra.mxu0 %v72_v1  ;;  %3735 = vmatprep.subr.mxu1 %v68_v5  ;;  %v3868_v11 = vld [vmem:[%s5371_s0 + $0x20] sm:$0xff]  ;;  %v81_v13 = vld [vmem:[%s5370_s1 + $0x78] sm:$0xf]  ;;  %v3885_v14 = vld [vmem:[%s5371_s0 + $0x30] sm:$0xff] }
   0x6   :  { %3176 = vmatprep.subr.mxu0 %v71_v3  ;;  %3739 = vmatpush3.msra.mxu1 %v68_v5  ;;  %v3894_v15 = vld [vmem:[%s5371_s0 + $0x38] sm:$0xff]  ;;  %v80_v16 = vld [vmem:[%s5370_s1 + $0x70] sm:$0xff]  ;;  %v3908_v17 = vld [vmem:[%s5371_s0 + $0x40] sm:$0xff] }
   0x7   :  { %3177 = vmatpush3.msra.mxu0 %v71_v3  ;;  %3736 = vmatprep.subr.mxu1 %v67_v7  ;;  %v3917_v18 = vld [vmem:[%s5371_s0 + $0x48] sm:$0xff]  ;;  %v3929_v20 = vld [vmem:[%s5371_s0 + $0x50] sm:$0xff]  ;;  %v77_v21 = vld [vmem:[%s5370_s1 + $0x58] sm:$0xf] }
   0x8   :  { %3178 = vmatprep.subr.mxu0 %v70_v6  ;;  %3740 = vmatpush3.msra.mxu1 %v67_v7  ;;  %v79_v19 = vld [vmem:[%s5370_s1 + $0x68] sm:$0xff]  ;;  %v3941_v22 = vld [vmem:[%s5371_s0 + $0x58] sm:$0xff]  ;;  %v78_v23 = vld [vmem:[%s5370_s1 + $0x60] sm:$0xff] }
   0x9   :  { %3179 = vmatpush3.msra.mxu0 %v70_v6  ;;  %3737 = vmatprep.subr.mxu1 %v66_v10  ;;  %v3954_v24 = vld [vmem:[%s5371_s0 + $0x60] sm:$0xff]  ;;  %v3963_v25 = vld [vmem:[%s5371_s0 + $0x68] sm:$0xff]  ;;  %v3972_v26 = vld [vmem:[%s5371_s0 + $0x70] sm:$0xff] }
   0xa   :  { %3181 = vmatmul.mubr.msk.f32.vlgmr.msra.gmra.mxu0 %vm86_vm1, %v3849_v8  ;;  %3216 = vmatprep.subr.msk.mxu0 %vm159_vm0, %v69_v4  ;;  %v3981_v27 = vld [vmem:[%s5371_s0 + $0x78] sm:$0xff]  ;;  %v3990_v28 = vld [vmem:[%s5371_s0 + $0x80] sm:$0xff]  ;;  %v3999_v29 = vld [vmem:[%s5371_s0 + $0x88] sm:$0xff] }
   0xb   :  { %3217 = vmatpush3.msk.msra.mxu0 %vm159_vm0, %v69_v4  ;;  %3183 = vmatprep.mubr.msk.f32.mxu0 %vm86_vm1, %v3854_v9  ;;  %v4008_v30 = vld [vmem:[%s5371_s0 + $0x90] sm:$0xff]  ;;  %v4017_v31 = vld [vmem:[%s5371_s0 + $0x98] sm:$0xff]  ;;  %v4026_v32 = vld [vmem:[%s5371_s0 + $0xa0] sm:$0xff] }
   0xc   :  { %3230 = vmatprep.mubr.msk.f32.mxu1 %vm86_vm1, %v3868_v11  ;;  %3741 = vmatpush3.msra.mxu1 %v66_v10  ;;  %v4035_v33 = vld [vmem:[%s5371_s0 + $0xa8] sm:$0xff]  ;;  %v4044_v34 = vld [vmem:[%s5371_s0 + $0xb0] sm:$0xff]  ;;  %v4053_v35 = vld [vmem:[%s5371_s0 + $0xb8] sm:$0xff] }
   0xd   :  { %3218 = vmatprep.subr.mxu0 %v68_v5  ;;  %3231 = vmatmul.mubr.msk.f32.vlgmr.msra.gmra.mxu1 %vm86_vm1, %v3873_v12  ;;  %v4066_v36 = vld [vmem:[%s5371_s0 + $0xc0] sm:$0xff]  ;;  %v76_v38 = vld [vmem:[%s5370_s1 + $0x50] sm:$0xff]  ;;  %v75_v39 = vld [vmem:[%s5370_s1 + $0x48] sm:$0xff] }
   0xe   :  { %3184 = vmatmul.mubr.msk.f32.gmra.mxu0 %vm86_vm1, %v3868_v11  ;;  %3233 = vmatprep.mubr.msk.f32.mxu1 %vm86_vm1, %v3885_v14  ;;  %v38_v37 = vld [vmem:[%s5371_s0] sm:$0xff]  ;;  %v85_v41 = vld [vmem:[%s5370_s1 + $0x98] sm:$0xf]  ;;  %v84_v42 = vld [vmem:[%s5370_s1 + $0x90] sm:$0xff] }
   0xf   :  { %3186 = vmatprep.mubr.msk.f32.mxu0 %vm86_vm1, %v3873_v12  ;;  %3219 = vmatpush3.msra.mxu0 %v68_v5  ;;  %v74_v40 = vld [vmem:[%s5370_s1 + $0x40] sm:$0xff]  ;;  %v83_v43 = vld [vmem:[%s5370_s1 + $0x88] sm:$0xff]  ;;  %v64_v46 = vld [vmem:[%s5371_s0 + $0xd0] sm:$0xff] }
  0x10   :  { %3304 = vmatprep.subr.msk.mxu1 %vm159_vm0, %v81_v13  ;;  %3220 = vmatprep.subr.mxu0 %v67_v7  ;;  %v82_v44 = vld [vmem:[%s5370_s1 + $0x80] sm:$0xff]  ;;  %v63_v45 = vld [vmem:[%s5371_s0 + $0xc8] sm:$0xff]  ;;  %v65_v47 = vld [vmem:[%s5371_s0 + $0xd8] sm:$0xff] }
  0x11   :  { %3305 = vmatpush3.msk.msra.mxu1 %vm159_vm0, %v81_v13  ;;  %3221 = vmatpush3.msra.mxu0 %v67_v7 }
  0x12   :  { %3187 = vmatmul.mubr.msk.f32.gmra.mxu0 %vm86_vm1, %v3885_v14  ;;  %3234 = vmatmul.mubr.msk.f32.gmra.mxu1 %vm86_vm1, %v3894_v15 }
  0x13   :  { %3189 = vmatprep.mubr.msk.f32.mxu0 %vm86_vm1, %v3894_v15  ;;  %3236 = vmatprep.mubr.msk.f32.mxu1 %vm86_vm1, %v3908_v17 }
  0x14   :  { %3306 = vmatprep.subr.mxu1 %v80_v16  ;;  %3222 = vmatprep.subr.mxu0 %v66_v10 }
  0x15   :  { %3307 = vmatpush3.msra.mxu1 %v80_v16  ;;  %3223 = vmatpush3.msra.mxu0 %v66_v10 }
  0x16   :  { %3190 = vmatmul.mubr.msk.f32.gmra.mxu0 %vm86_vm1, %v3908_v17  ;;  %3237 = vmatmul.mubr.msk.f32.gmra.mxu1 %vm86_vm1, %v3917_v18 }
  0x17   :  { %3192 = vmatprep.mubr.msk.f32.mxu0 %vm86_vm1, %v3917_v18  ;;  %3239 = vmatprep.mubr.msk.f32.mxu1 %vm86_vm1, %v3929_v20 }
  0x18   :  { %3308 = vmatprep.subr.mxu1 %v79_v19  ;;  %3260 = vmatprep.subr.msk.mxu0 %vm159_vm0, %v77_v21 }
  0x19   :  { %3309 = vmatpush3.msra.mxu1 %v79_v19  ;;  %v1394_v19 = vld [vmem:[%s5372_s3 + $0xb8] sm:$0xf] }
  0x1a   :  { %3193 = vmatmul.mubr.msk.f32.gmra.mxu0 %vm86_vm1, %v3929_v20  ;;  %3240 = vmatmul.mubr.msk.f32.gmra.mxu1 %vm86_vm1, %v3941_v22 }
  0x1b   :  { %3195 = vmatprep.mubr.msk.f32.mxu0 %vm86_vm1, %v3941_v22  ;;  %3242 = vmatprep.mubr.msk.f32.mxu1 %vm86_vm1, %v3954_v24 }
  0x1c   :  { %3310 = vmatprep.subr.mxu1 %v78_v23 }
  0x1d   :  { %3311 = vmatpush3.msra.mxu1 %v78_v23  ;;  %v1406_v23 = vld [vmem:[%s5372_s3 + $0x118] sm:$0xf] }
  0x1e   :  { %3196 = vmatmul.mubr.msk.f32.gmra.mxu0 %vm86_vm1, %v3954_v24  ;;  %3243 = vmatmul.mubr.msk.f32.gmra.mxu1 %vm86_vm1, %v3963_v25 }
  0x1f   :  { %3198 = vmatprep.mubr.msk.f32.mxu0 %vm86_vm1, %v3963_v25  ;;  %3245 = vmatprep.mubr.msk.f32.mxu1 %vm86_vm1, %v3972_v26 }
  0x20   :  { %3392 = vmatprep.subr.msk.mxu1 %vm159_vm0, %v1394_v19 }
  0x22   :  { %3199 = vmatmul.mubr.msk.f32.gmra.mxu0 %vm86_vm1, %v3972_v26  ;;  %3246 = vmatmul.mubr.msk.f32.gmra.mxu1 %vm86_vm1, %v3981_v27 }
  0x23   :  { %3201 = vmatprep.mubr.msk.f32.mxu0 %vm86_vm1, %v3981_v27  ;;  %3248 = vmatprep.mubr.msk.f32.mxu1 %vm86_vm1, %v3990_v28 }
  0x26   :  { %3202 = vmatmul.mubr.msk.f32.gmra.mxu0 %vm86_vm1, %v3990_v28  ;;  %3249 = vmatmul.mubr.msk.f32.gmra.mxu1 %vm86_vm1, %v3999_v29 }
  0x27   :  { %3204 = vmatprep.mubr.msk.f32.mxu0 %vm86_vm1, %v3999_v29  ;;  %3251 = vmatprep.mubr.msk.f32.mxu1 %vm86_vm1, %v4008_v30 }
  0x2a   :  { %3205 = vmatmul.mubr.msk.f32.gmra.mxu0 %vm86_vm1, %v4008_v30  ;;  %3252 = vmatmul.mubr.msk.f32.gmra.mxu1 %vm86_vm1, %v4017_v31 }
  0x2b   :  { %3207 = vmatprep.mubr.msk.f32.mxu0 %vm86_vm1, %v4017_v31  ;;  %3254 = vmatprep.mubr.msk.f32.mxu1 %vm86_vm1, %v4026_v32 }
  0x2e   :  { %3208 = vmatmul.mubr.msk.f32.gmra.mxu0 %vm86_vm1, %v4026_v32  ;;  %3255 = vmatmul.mubr.msk.f32.gmra.mxu1 %vm86_vm1, %v4035_v33 }
  0x2f   :  { %3210 = vmatprep.mubr.msk.f32.mxu0 %vm86_vm1, %v4035_v33  ;;  %3257 = vmatprep.mubr.msk.f32.mxu1 %vm86_vm1, %v4044_v34 }
  0x32   :  { %3211 = vmatmul.mubr.msk.f32.gmra.mxu0 %vm86_vm1, %v4044_v34  ;;  %3258 = vmatmul.mubr.msk.f32.gmra.mxu1 %vm86_vm1, %v4053_v35 }
  0x33   :  { %3213 = vmatprep.mubr.msk.f32.mxu0 %vm86_vm1, %v4053_v35  ;;  %3312 = vmatprep.mubr.msk.f32.mxu1 %vm86_vm1, %v3854_v9 }
  0x36   :  { %3214 = vmatmul.mubr.msk.f32.gmra.mxu0 %vm86_vm1, %v4066_v36  ;;  %3313 = vmatmul.mubr.msk.f32.vlgmr.msra.gmra.mxu1 %vm86_vm1, %v3868_v11 }
  0x37   :  { %3224 = vmatprep.mubr.msk.f32.mxu0 %vm86_vm1, %v38_v37  ;;  %3315 = vmatprep.mubr.msk.f32.mxu1 %vm86_vm1, %v3873_v12 }
  0x38   :  { %3393 = vmatpush3.msk.msra.mxu1 %vm159_vm0, %v1394_v19 }
  0x3a   :  { %3225 = vmatmul.mubr.msk.f32.vlgmr.msra.gmra.mxu0 %vm86_vm1, %v3824_v2  ;;  %3316 = vmatmul.mubr.msk.f32.gmra.mxu1 %vm86_vm1, %v3885_v14 }
  0x3b   :  { %3261 = vmatpush3.msk.msra.mxu0 %vm159_vm0, %v77_v21  ;;  %3227 = vmatprep.mubr.msk.f32.mxu0 %vm86_vm1, %v3849_v8 }
  0x3c   :  { %3262 = vmatprep.subr.mxu0 %v76_v38  ;;  %3318 = vmatprep.mubr.msk.f32.mxu1 %vm86_vm1, %v3894_v15 }
  0x3d   :  { %3263 = vmatpush3.msra.mxu0 %v76_v38 }
  0x3e   :  { %3228 = vmatmul.mubr.msk.f32.gmra.mxu0 %vm86_vm1, %v3854_v9  ;;  %3264 = vmatprep.subr.mxu0 %v75_v39 }
  0x3f   :  { %3265 = vmatpush3.msra.mxu0 %v75_v39  ;;  %3268 = vmatprep.mubr.msk.f32.mxu0 %vm86_vm1, %v3849_v8  ;;  %v1387_v39 = vld [vmem:[%s5372_s3 + $0x80] sm:$0xff] }
  0x40   :  { %3266 = vmatprep.subr.mxu0 %v74_v40  ;;  %3319 = vmatmul.mubr.msk.f32.gmra.mxu1 %vm86_vm1, %v3908_v17 }
  0x41   :  { %3267 = vmatpush3.msra.mxu0 %v74_v40  ;;  %3321 = vmatprep.mubr.msk.f32.mxu1 %vm86_vm1, %v3917_v18 }
  0x42   :  { %3269 = vmatmul.mubr.msk.f32.vlgmr.msra.gmra.mxu0 %vm86_vm1, %v3854_v9  ;;  %3348 = vmatprep.subr.msk.mxu0 %vm159_vm0, %v85_v41 }
  0x43   :  { %3349 = vmatpush3.msk.msra.mxu0 %vm159_vm0, %v85_v41  ;;  %3271 = vmatprep.mubr.msk.f32.mxu0 %vm86_vm1, %v3868_v11 }
  0x44   :  { %3350 = vmatprep.subr.mxu0 %v84_v42  ;;  %3322 = vmatmul.mubr.msk.f32.gmra.mxu1 %vm86_vm1, %v3929_v20 }
  0x45   :  { %3351 = vmatpush3.msra.mxu0 %v84_v42  ;;  %3324 = vmatprep.mubr.msk.f32.mxu1 %vm86_vm1, %v3941_v22 }
  0x46   :  { %3272 = vmatmul.mubr.msk.f32.gmra.mxu0 %vm86_vm1, %v3873_v12  ;;  %3352 = vmatprep.subr.mxu0 %v83_v43 }
  0x47   :  { %3274 = vmatprep.mubr.msk.f32.mxu0 %vm86_vm1, %v3885_v14  ;;  %3353 = vmatpush3.msra.mxu0 %v83_v43 }
  0x48   :  { %3325 = vmatmul.mubr.msk.f32.gmra.mxu1 %vm86_vm1, %v3954_v24  ;;  %3354 = vmatprep.subr.mxu0 %v82_v44 }
  0x49   :  { %3327 = vmatprep.mubr.msk.f32.mxu1 %vm86_vm1, %v3963_v25  ;;  %3355 = vmatpush3.msra.mxu0 %v82_v44 }
  0x4a   :  { %3275 = vmatmul.mubr.msk.f32.gmra.mxu0 %vm86_vm1, %v3894_v15  ;;  %3464 = vmatprep.subr.msk.mxu0 %vm159_vm0, %v1406_v23 }
  0x4b   :  { %3277 = vmatprep.mubr.msk.f32.mxu0 %vm86_vm1, %v3908_v17 }
  0x4c   :  { %3328 = vmatmul.mubr.msk.f32.gmra.mxu1 %vm86_vm1, %v3972_v26 }
  0x4d   :  { %3330 = vmatprep.mubr.msk.f32.mxu1 %vm86_vm1, %v3981_v27 }
  0x4e   :  { %3278 = vmatmul.mubr.msk.f32.gmra.mxu0 %vm86_vm1, %v3917_v18 }
  0x4f   :  { %3280 = vmatprep.mubr.msk.f32.mxu0 %vm86_vm1, %v3929_v20 }
  0x50   :  { %3331 = vmatmul.mubr.msk.f32.gmra.mxu1 %vm86_vm1, %v3990_v28 }
  0x51   :  { %3333 = vmatprep.mubr.msk.f32.mxu1 %vm86_vm1, %v3999_v29 }
  0x52   :  { %3281 = vmatmul.mubr.msk.f32.gmra.mxu0 %vm86_vm1, %v3941_v22 }
  0x53   :  { %3283 = vmatprep.mubr.msk.f32.mxu0 %vm86_vm1, %v3954_v24 }
  0x54   :  { %3334 = vmatmul.mubr.msk.f32.gmra.mxu1 %vm86_vm1, %v4008_v30 }
  0x55   :  { %3336 = vmatprep.mubr.msk.f32.mxu1 %vm86_vm1, %v4017_v31 }
  0x56   :  { %3284 = vmatmul.mubr.msk.f32.gmra.mxu0 %vm86_vm1, %v3963_v25 }
  0x57   :  { %3286 = vmatprep.mubr.msk.f32.mxu0 %vm86_vm1, %v3972_v26 }
  0x58   :  { %3337 = vmatmul.mubr.msk.f32.gmra.mxu1 %vm86_vm1, %v4026_v32 }
  0x59   :  { %3339 = vmatprep.mubr.msk.f32.mxu1 %vm86_vm1, %v4035_v33 }
  0x5a   :  { %3287 = vmatmul.mubr.msk.f32.gmra.mxu0 %vm86_vm1, %v3981_v27 }
  0x5b   :  { %3289 = vmatprep.mubr.msk.f32.mxu0 %vm86_vm1, %v3990_v28 }
  0x5c   :  { %3340 = vmatmul.mubr.msk.f32.gmra.mxu1 %vm86_vm1, %v4044_v34 }
  0x5d   :  { %3342 = vmatprep.mubr.msk.f32.mxu1 %vm86_vm1, %v4053_v35 }
  0x5e   :  { %3290 = vmatmul.mubr.msk.f32.gmra.mxu0 %vm86_vm1, %v3999_v29 }
  0x5f   :  { %3292 = vmatprep.mubr.msk.f32.mxu0 %vm86_vm1, %v4008_v30 }
  0x60   :  { %3343 = vmatmul.mubr.msk.f32.gmra.mxu1 %vm86_vm1, %v4066_v36 }
  0x61   :  { %3345 = vmatprep.mubr.msk.f32.mxu1 %vm86_vm1, %v63_v45 }
  0x62   :  { %3293 = vmatmul.mubr.msk.f32.gmra.mxu0 %vm86_vm1, %v4017_v31 }
  0x63   :  { %3295 = vmatprep.mubr.msk.f32.mxu0 %vm86_vm1, %v4026_v32 }
  0x64   :  { %3346 = vmatmul.mubr.msk.f32.gmra.mxu1 %vm86_vm1, %v64_v46 }
  0x66   :  { %3296 = vmatmul.mubr.msk.f32.gmra.mxu0 %vm86_vm1, %v4035_v33 }
  0x67   :  { %3298 = vmatprep.mubr.msk.f32.mxu0 %vm86_vm1, %v4044_v34 }
  0x6a   :  { %3299 = vmatmul.mubr.msk.f32.gmra.mxu0 %vm86_vm1, %v4053_v35 }
  0x6b   :  { %3301 = vmatprep.mubr.msk.f32.mxu0 %vm86_vm1, %v4066_v36 }
  0x6e   :  { %3302 = vmatmul.mubr.msk.f32.gmra.mxu0 %vm86_vm1, %v63_v45 }
  0x6f   :  { %3356 = vmatprep.mubr.msk.f32.mxu0 %vm86_vm1, %v3868_v11 }
  0x72   :  { %3357 = vmatmul.mubr.msk.f32.vlgmr.msra.gmra.mxu0 %vm86_vm1, %v3873_v12 }
  0x73   :  { %3359 = vmatprep.mubr.msk.f32.mxu0 %vm86_vm1, %v3885_v14  ;;  %3465 = vmatpush3.msk.msra.mxu0 %vm159_vm0, %v1406_v23 }
  0x76   :  { %3360 = vmatmul.mubr.msk.f32.gmra.mxu0 %vm86_vm1, %v3894_v15 }
  0x77   :  { %3362 = vmatprep.mubr.msk.f32.mxu0 %vm86_vm1, %v3908_v17 }
  0x7a   :  { %3363 = vmatmul.mubr.msk.f32.gmra.mxu0 %vm86_vm1, %v3917_v18 }
  0x7b   :  { %3365 = vmatprep.mubr.msk.f32.mxu0 %vm86_vm1, %v3929_v20  ;;  %v1393_v20 = vld [vmem:[%s5372_s3 + $0xb0] sm:$0xff] }
  0x7c   :  { %3394 = vmatprep.subr.mxu1 %v1393_v20 }
  0x7d   :  { %3395 = vmatpush3.msra.mxu1 %v1393_v20 }
  0x7e   :  { %3366 = vmatmul.mubr.msk.f32.gmra.mxu0 %vm86_vm1, %v3941_v22  ;;  %v1392_v22 = vld [vmem:[%s5372_s3 + $0xa8] sm:$0xff] }
  0x7f   :  { %3368 = vmatprep.mubr.msk.f32.mxu0 %vm86_vm1, %v3954_v24  ;;  %v1405_v24 = vld [vmem:[%s5372_s3 + $0x110] sm:$0xff]  ;;  %3396 = vmatprep.subr.mxu1 %v1392_v22 }
  0x80   :  { %3466 = vmatprep.subr.mxu0 %v1405_v24  ;;  %3397 = vmatpush3.msra.mxu1 %v1392_v22 }
  0x81   :  { %3467 = vmatpush3.msra.mxu0 %v1405_v24 }
  0x82   :  { %3369 = vmatmul.mubr.msk.f32.gmra.mxu0 %vm86_vm1, %v3963_v25 }
  0x83   :  { %3371 = vmatprep.mubr.msk.f32.mxu0 %vm86_vm1, %v3972_v26 }
  0x86   :  { %3372 = vmatmul.mubr.msk.f32.gmra.mxu0 %vm86_vm1, %v3981_v27  ;;  %v1391_v27 = vld [vmem:[%s5372_s3 + $0xa0] sm:$0xff] }
  0x87   :  { %3374 = vmatprep.mubr.msk.f32.mxu0 %vm86_vm1, %v3990_v28  ;;  %v1404_v28 = vld [vmem:[%s5372_s3 + $0x108] sm:$0xff]  ;;  %3398 = vmatprep.subr.mxu1 %v1391_v27 }
  0x88   :  { %3468 = vmatprep.subr.mxu0 %v1404_v28  ;;  %3399 = vmatpush3.msra.mxu1 %v1391_v27 }
  0x89   :  { %3469 = vmatpush3.msra.mxu0 %v1404_v28 }
  0x8a   :  { %3375 = vmatmul.mubr.msk.f32.gmra.mxu0 %vm86_vm1, %v3999_v29 }
  0x8b   :  { %3377 = vmatprep.mubr.msk.f32.mxu0 %vm86_vm1, %v4008_v30  ;;  %v1390_v30 = vld [vmem:[%s5372_s3 + $0x98] sm:$0xff] }
  0x8c   :  { %3400 = vmatprep.subr.mxu1 %v1390_v30 }
  0x8d   :  { %3401 = vmatpush3.msra.mxu1 %v1390_v30 }
  0x8e   :  { %3378 = vmatmul.mubr.msk.f32.gmra.mxu0 %vm86_vm1, %v4017_v31  ;;  %v1403_v31 = vld [vmem:[%s5372_s3 + $0x100] sm:$0xff] }
  0x8f   :  { %3380 = vmatprep.mubr.msk.f32.mxu0 %vm86_vm1, %v4026_v32  ;;  %3470 = vmatprep.subr.mxu0 %v1403_v31 }
  0x90   :  { %3471 = vmatpush3.msra.mxu0 %v1403_v31 }
  0x92   :  { %3381 = vmatmul.mubr.msk.f32.gmra.mxu0 %vm86_vm1, %v4035_v33 }
  0x93   :  { %3383 = vmatprep.mubr.msk.f32.mxu0 %vm86_vm1, %v4044_v34  ;;  %v1389_v34 = vld [vmem:[%s5372_s3 + $0x90] sm:$0xff] }
  0x94   :  { %3402 = vmatprep.subr.mxu1 %v1389_v34 }
  0x95   :  { %3403 = vmatpush3.msra.mxu1 %v1389_v34 }
  0x96   :  { %3384 = vmatmul.mubr.msk.f32.gmra.mxu0 %vm86_vm1, %v4053_v35 }
  0x97   :  { %3386 = vmatprep.mubr.msk.f32.mxu0 %vm86_vm1, %v4066_v36  ;;  %v1388_v36 = vld [vmem:[%s5372_s3 + $0x88] sm:$0xff] }
  0x98   :  { %3404 = vmatprep.subr.mxu1 %v1388_v36 }
  0x99   :  { %3405 = vmatpush3.msra.mxu1 %v1388_v36 }
  0x9a   :  { %3387 = vmatmul.mubr.msk.f32.gmra.mxu0 %vm86_vm1, %v63_v45  ;;  %3406 = vmatprep.subr.mxu1 %v1387_v39 }
  0x9b   :  { %3389 = vmatprep.mubr.msk.f32.mxu0 %vm86_vm1, %v64_v46  ;;  %3407 = vmatpush3.msra.mxu1 %v1387_v39 }
  0x9e   :  { %3390 = vmatmul.mubr.msk.f32.gmra.mxu0 %vm86_vm1, %v65_v47 }
  0xca   :  { %v4251_v48 = vpop.f32.mrf.mxu0 }
  0xcc   :  { %v4253_v49 = vpop.f32.mrf.mxu0 }
  0xcd   :  { %v4257_v51 = vpop.f32.mrf.mxu1 }
  0xce   :  { %v4255_v50 = vpop.f32.mrf.mxu0 }
  0xcf   :  { %v4261_v53 = vpop.f32.mrf.mxu1 }
  0xd0   :  { %v4259_v52 = vpop.f32.mrf.mxu0 }
  0xd2   :  { %v4263_v54 = vpop.f32.mrf.mxu0  ;;  %v4265_v55 = vpop.f32.mrf.mxu1 }
  0xd4   :  { %v4267_v56 = vpop.f32.mrf.mxu0  ;;  %v4269_v57 = vpop.f32.mrf.mxu1 }
  0xd6   :  { %v4271_v58 = vpop.f32.mrf.mxu0  ;;  %v4273_v59 = vpop.f32.mrf.mxu1 }
  0xd8   :  { %v4275_v60 = vpop.f32.mrf.mxu0  ;;  %v4277_v61 = vpop.f32.mrf.mxu1 }
  0xda   :  { %v4279_v62 = vpop.f32.mrf.mxu0  ;;  %v4281_v63 = vpop.f32.mrf.mxu1 }
  0xdc   :  { %v4283_v0 = vpop.f32.mrf.mxu0  ;;  %v4285_v1 = vpop.f32.mrf.mxu1 }
  0xde   :  { %v4287_v2 = vpop.f32.mrf.mxu0  ;;  %v4289_v3 = vpop.f32.mrf.mxu1 }
  0xe0   :  { %v4291_v4 = vpop.f32.mrf.mxu0  ;;  %v4293_v5 = vpop.f32.mrf.mxu1 }
  0xe2   :  { %v4295_v6 = vpop.f32.mrf.mxu0  ;;  %v4297_v7 = vpop.f32.mrf.mxu1 }
  0xe4   :  { %v4299_v8 = vpop.f32.mrf.mxu0  ;;  %v4301_v9 = vpop.f32.mrf.mxu1 }
  0xe6   :  { %v4303_v10 = vpop.f32.mrf.mxu0  ;;  %v4305_v11 = vpop.f32.mrf.mxu1 }
  0xe8   :  { %v4307_v12 = vpop.f32.mrf.mxu0  ;;  %v4309_v13 = vpop.f32.mrf.mxu1 }
  0xe9   :  { %5382 = vst [vmem:[#allocation2_spill] sm:$0xff] %v4309_v13  ;;  %v1400_v13 = vld [vmem:[%s5372_s3 + $0xe8] sm:$0xff] }
  0xea   :  { %v4311_v14 = vpop.f32.mrf.mxu0  ;;  %v4313_v15 = vpop.f32.mrf.mxu1 }
  0xeb   :  { %5383 = vst [vmem:[#allocation3_spill] sm:$0xff] %v4313_v15 }
  0xec   :  { %v4315_v16 = vpop.f32.mrf.mxu0  ;;  %v4319_v18 = vpop.f32.mrf.mxu1 }
  0xed   :  { %5384 = vst [vmem:[#allocation4_spill] sm:$0xff] %v4315_v16  ;;  %5386 = vst [vmem:[#allocation6_spill] sm:$0xff] %v4319_v18 }
  0xee   :  { %v4317_v17 = vpop.f32.mrf.mxu0  ;;  %v4343_v26 = vpop.f32.mrf.mxu1 }
  0xef   :  { %5385 = vst [vmem:[#allocation5_spill] sm:$0xff] %v4317_v17  ;;  %5389 = vst [vmem:[#allocation9_spill] sm:$0xff] %v4343_v26 }
  0xf0   :  { %v4328_v21 = vpop.f32.mrf.mxu0  ;;  %v4360_v32 = vpop.f32.mrf.mxu1 }
  0xf1   :  { %5387 = vst [vmem:[#allocation7_spill] sm:$0xff] %v4328_v21  ;;  %5391 = vst [vmem:[#allocation11_spill] sm:$0xff] %v4360_v32 }
  0xf2   :  { %v4341_v25 = vpop.f32.mrf.mxu0  ;;  %v4372_v37 = vpop.f32.mrf.mxu1 }
  0xf3   :  { %5388 = vst [vmem:[#allocation8_spill] sm:$0xff] %v4341_v25  ;;  %5394 = vst [vmem:[#allocation14_spill] sm:$0xff] %v4372_v37 }
  0xf4   :  { %v4352_v29 = vpop.f32.mrf.mxu0  ;;  %v4379_v43 = vpop.f32.mrf.mxu1 }
  0xf5   :  { %5390 = vst [vmem:[#allocation10_spill] sm:$0xff] %v4352_v29  ;;  %5395 = vst [vmem:[#allocation15_spill] sm:$0xff] %v4379_v43 }
  0xf6   :  { %v4362_v33 = vpop.f32.mrf.mxu0  ;;  %v4381_v46 = vpop.f32.mrf.mxu1 }
  0xf7   :  { %5392 = vst [vmem:[#allocation12_spill] sm:$0xff] %v4362_v33  ;;  %5396 = vst [vmem:[#allocation16_spill] sm:$0xff] %v4381_v46 }
  0xf8   :  { %v4367_v35 = vpop.f32.mrf.mxu0  ;;  %v4385_v22 = vpop.f32.mrf.mxu1 }
  0xf9   :  { %5393 = vst [vmem:[#allocation13_spill] sm:$0xff] %v4367_v35  ;;  %5398 = vst [vmem:[#allocation18_spill] sm:$0xff] %v4385_v22 }
  0xfa   :  { %v3226_v38 = vpop.f32.mrf.mxu0  ;;  %v3317_v27 = vpop.f32.mrf.mxu1 }
  0xfb   :  { %v426_v40 = vadd.f32 %v3226_v38, %v4251_v48 }
  0xfc   :  { %v420_v41 = vpop.f32.mrf.mxu0  ;;  %v836_v28 = vpop.f32.mrf.mxu1 }
  0xfd   :  { %v421_v42 = vadd.f32 %v420_v41, %v4253_v49 }
  0xfe   :  { %v3229_v44 = vpop.f32.mrf.mxu0 }
  0xff   :  { %v436_v21 = vadd.f32 %v3229_v44, %v4255_v50 }
 0x100   :  { %v430_v45 = vpop.f32.mrf.mxu0  ;;  %v4391_v34 = vpop.f32.mrf.mxu1 }
 0x102   :  { %v3270_v47 = vpop.f32.mrf.mxu0  ;;  %v4397_v39 = vpop.f32.mrf.mxu1 }
 0x103   :  { %v4383_v19 = vadd.f32 %v3270_v47, %v426_v40 }
 0x104   :  { %v611_v20 = vpop.f32.mrf.mxu0 }
 0x105   :  { %5397 = vst [vmem:[#allocation17_spill] sm:$0xff] %v4383_v19  ;;  %v4387_v48 = vadd.f32 %v611_v20, %v421_v42  ;;  %v4403_v42 = vpop.f32.mrf.mxu1 }
 0x106   :  { %v3273_v23 = vpop.f32.mrf.mxu0 }
 0x107   :  { %5399 = vst [vmem:[#allocation19_spill] sm:$0xff] %v4387_v48  ;;  %v4409_v37 = vpop.f32.mrf.mxu1  ;;  %v733_v50 = vadd.f32 %v3273_v23, %v436_v21 }
 0x108   :  { %v621_v24 = vpop.f32.mrf.mxu0 }
 0x109   :  { %v4415_v35 = vpop.f32.mrf.mxu1  ;;  %v948_v21 = vadd.f32 %v3317_v27, %v733_v50 }
 0x10a   :  { %v3276_v49 = vpop.f32.mrf.mxu0 }
 0x10b   :  { %v4421_v46 = vpop.f32.mrf.mxu1 }
 0x10c   :  { %v631_v30 = vpop.f32.mrf.mxu0 }
 0x10d   :  { %v4427_v29 = vpop.f32.mrf.mxu1 }
 0x10e   :  { %v4389_v31 = vpop.f32.mrf.mxu0 }
 0x10f   :  { %v4433_v15 = vpop.f32.mrf.mxu1 }
 0x110   :  { %v4393_v36 = vpop.f32.mrf.mxu0 }
 0x112   :  { %v4395_v38 = vpop.f32.mrf.mxu0 }
 0x114   :  { %v4399_v40 = vpop.f32.mrf.mxu0 }
 0x116   :  { %v4401_v41 = vpop.f32.mrf.mxu0 }
 0x118   :  { %v4405_v47 = vpop.f32.mrf.mxu0 }
 0x11a   :  { %v4407_v20 = vpop.f32.mrf.mxu0 }
 0x11c   :  { %v4411_v33 = vpop.f32.mrf.mxu0 }
 0x11e   :  { %v4413_v43 = vpop.f32.mrf.mxu0 }
 0x120   :  { %v4417_v26 = vpop.f32.mrf.mxu0 }
 0x121   :  { %5400 = vst [vmem:[#allocation20_spill] sm:$0xff] %v4417_v26 }
 0x122   :  { %v4419_v25 = vpop.f32.mrf.mxu0 }
 0x123   :  { %5401 = vst [vmem:[#allocation21_spill] sm:$0xff] %v4419_v25  ;;  %v4443_v25 = vpop.f32.mrf.mxu1 }
 0x124   :  { %v4423_v19 = vpop.f32.mrf.mxu0 }
 0x125   :  { %5402 = vst [vmem:[#allocation22_spill] sm:$0xff] %v4423_v19  ;;  %v1402_v19 = vld [vmem:[%s5372_s3 + $0xf8] sm:$0xff]  ;;  %v4461_v16 = vpop.f32.mrf.mxu1 }
 0x126   :  { %v4425_v32 = vpop.f32.mrf.mxu0  ;;  %3472 = vmatprep.subr.mxu0 %v1402_v19 }
 0x127   :  { %5403 = vst [vmem:[#allocation23_spill] sm:$0xff] %v4425_v32  ;;  %3473 = vmatpush3.msra.mxu0 %v1402_v19 }
 0x128   :  { %v4429_v22 = vpop.f32.mrf.mxu0 }
 0x129   :  { %5404 = vst [vmem:[#allocation24_spill] sm:$0xff] %v4429_v22 }
 0x12a   :  { %v4431_v48 = vpop.f32.mrf.mxu0 }
 0x12b   :  { %5405 = vst [vmem:[#allocation25_spill] sm:$0xff] %v4431_v48  ;;  %v1386_v48 = vld [vmem:[%s5372_s3 + $0x78] sm:$0xff] }
 0x12c   :  { %v4435_v17 = vpop.f32.mrf.mxu0  ;;  %3408 = vmatprep.subr.mxu1 %v1386_v48 }
 0x12d   :  { %5406 = vst [vmem:[#allocation26_spill] sm:$0xff] %v4435_v17  ;;  %v1401_v17 = vld [vmem:[%s5372_s3 + $0xf0] sm:$0xff]  ;;  %3409 = vmatpush3.msra.mxu1 %v1386_v48 }
 0x12e   :  { %v4437_v18 = vpop.f32.mrf.mxu0  ;;  %3474 = vmatprep.subr.mxu0 %v1401_v17 }
 0x12f   :  { %5407 = vst [vmem:[#allocation27_spill] sm:$0xff] %v4437_v18  ;;  %v431_v18 = vadd.f32 %v430_v45, %v4259_v52  ;;  %3475 = vmatpush3.msra.mxu0 %v1401_v17  ;;  %v441_v52 = vadd.f32 %v4261_v53, %v4267_v56  ;;  %v456_v17 = vadd.f32 %v4265_v55, %v4271_v58  ;;  %v1384_v56 = vld [vmem:[%s5372_s3 + $0x68] sm:$0xff]  ;;  %v4484_v58 = vpop.f32.mrf.mxu1 }
 0x130   :  { %v4445_v32 = vpop.f32.mrf.mxu0  ;;  %3476 = vmatprep.subr.mxu0 %v1400_v13 }
 0x131   :  { %5408 = vst [vmem:[#allocation28_spill] sm:$0xff] %v4445_v32  ;;  %v446_v32 = vadd.f32 %v4257_v51, %v4263_v54  ;;  %v732_v22 = vadd.f32 %v621_v24, %v431_v18  ;;  %v1385_v51 = vld [vmem:[%s5372_s3 + $0x70] sm:$0xff]  ;;  %3477 = vmatpush3.msra.mxu0 %v1400_v13  ;;  %v1399_v54 = vld [vmem:[%s5372_s3 + $0xe0] sm:$0xff]  ;;  %v734_v48 = vadd.f32 %v631_v30, %v441_v52  ;;  %v1398_v13 = vld [vmem:[%s5372_s3 + $0xd8] sm:$0xff] }
 0x132   :  { %v4454_v44 = vpop.f32.mrf.mxu0  ;;  %3410 = vmatprep.subr.mxu1 %v1385_v51  ;;  %3478 = vmatprep.subr.mxu0 %v1399_v54  ;;  %v737_v55 = vadd.f32 %v4389_v31, %v456_v17 }
 0x133   :  { %v735_v45 = vadd.f32 %v3276_v49, %v446_v32  ;;  %v947_v19 = vadd.f32 %v836_v28, %v732_v22  ;;  %3411 = vmatpush3.msra.mxu1 %v1385_v51  ;;  %3479 = vmatpush3.msra.mxu0 %v1399_v54  ;;  %v451_v32 = vadd.f32 %v4269_v57, %v4275_v60  ;;  %v4489_v22 = vld [vmem:[%s5373_s2] ss:$0 sm:$0xff]  ;;  %v1397_v60 = vld [vmem:[%s5372_s3 + $0xd0] sm:$0xff] }
 0x134   :  { %v4463_v26 = vpop.f32.mrf.mxu0  ;;  %3412 = vmatprep.subr.mxu1 %v1384_v56  ;;  %3480 = vmatprep.subr.mxu0 %v1398_v13  ;;  %v1383_v57 = vld [vmem:[%s5372_s3 + $0x60] sm:$0xff]  ;;  %v466_v28 = vadd.f32 %v4273_v59, %v4279_v62  ;;  %v461_v59 = vadd.f32 %v4277_v61, %v4283_v0  ;;  %v952_v62 = vadd.f32 %v4403_v42, %v737_v55 }
 0x135   :  { %v950_v24 = vadd.f32 %v4391_v34, %v735_v45  ;;  %3413 = vmatpush3.msra.mxu1 %v1384_v56  ;;  %3481 = vmatpush3.msra.mxu0 %v1398_v13  ;;  %v736_v30 = vadd.f32 %v4393_v36, %v451_v32  ;;  %v949_v34 = vadd.f32 %v4397_v39, %v734_v48  ;;  %v1396_v45 = vld [vmem:[%s5372_s3 + $0xc8] sm:$0xff]  ;;  %v4515_v36 = vpop.f32.mrf.mxu1  ;;  %v1395_v61 = vld [vmem:[%s5372_s3 + $0xc0] sm:$0xff]  ;;  %v4539_v13 = vld [vmem:[%s5372_s3 + $0x58] sm:$0xf] }
 0x136   :  { %v3361_v18 = vpop.f32.mrf.mxu0  ;;  %3414 = vmatprep.subr.mxu1 %v1383_v57  ;;  %3482 = vmatprep.subr.mxu0 %v1397_v60  ;;  %v739_v51 = vadd.f32 %v4395_v38, %v466_v28  ;;  %v476_v0 = vadd.f32 %v4281_v63, %v4287_v2  ;;  %v738_v38 = vadd.f32 %v4399_v40, %v461_v59 }
 0x137   :  { %v1163_v53 = vadd.f32 %v3361_v18, %v948_v21  ;;  %3415 = vmatpush3.msra.mxu1 %v1383_v57  ;;  %3483 = vmatpush3.msra.mxu0 %v1397_v60  ;;  %v951_v42 = vadd.f32 %v4409_v37, %v736_v30  ;;  %v471_v63 = vadd.f32 %v4285_v1, %v4291_v4  ;;  %v4543_v2 = vpop.f32.mrf.mxu1 }
 0x138   :  { %v1051_v23 = vpop.f32.mrf.mxu0  ;;  %3484 = vmatprep.subr.mxu0 %v1396_v45  ;;  %3428 = vmatprep.subr.msk.mxu1 %vm159_vm0, %v4539_v13  ;;  %v954_v40 = vadd.f32 %v4415_v35, %v739_v51  ;;  %v741_v32 = vadd.f32 %v4401_v41, %v476_v0  ;;  %v486_v1 = vadd.f32 %v4289_v3, %v4295_v6 }
 0x139   :  { %v1162_v27 = vadd.f32 %v1051_v23, %v947_v19  ;;  %v4493_v49 = vadd.f32 %v4489_v22, %v1163_v53  ;;  %3485 = vmatpush3.msra.mxu0 %v1396_v45  ;;  %v953_v4 = vadd.f32 %v4421_v46, %v738_v38  ;;  %v740_v23 = vadd.f32 %v4405_v47, %v471_v63  ;;  %v906_v28 = vpop.f32.mrf.mxu1 }
 0x13a   :  { %v3364_v31 = vpop.f32.mrf.mxu0  ;;  %3486 = vmatprep.subr.mxu0 %v1395_v61  ;;  %v481_v60 = vadd.f32 %v4293_v5, %v4299_v8  ;;  %v956_v3 = vadd.f32 %v4427_v29, %v741_v32  ;;  %v743_v6 = vadd.f32 %v4407_v20, %v486_v1 }
 0x13b   :  { %v4506_v50 = vadd.f32 %v4489_v22, %v1162_v27  ;;  %v1165_v52 = vadd.f32 %v3364_v31, %v950_v24  ;;  %v1218_v21 = vmax.f32 %v4493_v49, 0.0  ;;  %3487 = vmatpush3.msra.mxu0 %v1395_v61  ;;  %v496_v31 = vadd.f32 %v4297_v7, %v4303_v10  ;;  %v4591_v7 = vld [vmem:[%s5372_s3 + $0x1d8] sm:$0xf] }
 0x13c   :  { %v1061_v39 = vpop.f32.mrf.mxu0  ;;  %v742_v5 = vadd.f32 %v4411_v33, %v481_v60  ;;  %v491_v10 = vadd.f32 %v4301_v9, %v4307_v12  ;;  %3536 = vmatprep.subr.msk.mxu0 %vm159_vm0, %v4591_v7  ;;  %v958_v59 = vadd.f32 %v4443_v25, %v743_v6  ;;  %v506_v9 = vadd.f32 %v4305_v11, %v4311_v14  ;;  %v5411_v11 = vld [vmem:[#allocation2_spill] sm:$0xff] }
 0x13d   :  { %v1164_v54 = vadd.f32 %v1061_v39, %v949_v34  ;;  %1269 = vrot.lane.b32.xlu0 %v1218_v21, %s3750_s21  ;;  %v4522_v17 = vadd.f32 %v4489_v22, %v1165_v52  ;;  %v1217_v19 = vmax.f32 %v4506_v50, 0.0  ;;  %v955_v34 = vadd.f32 %v4433_v15, %v740_v23  ;;  %v4595_v15 = vpop.f32.mrf.mxu1  ;;  %v5415_v6 = vld [vmem:[#allocation6_spill] sm:$0xff]  ;;  %v1381_v50 = vld [vmem:[%s5372_s3 + $0x50] sm:$0xff] }
 0x13e   :  { %v3367_v18 = vpop.f32.mrf.mxu0  ;;  %v957_v12 = vadd.f32 %v4461_v16, %v742_v5 }
 0x13f   :  { %v4533_v48 = vadd.f32 %v4489_v22, %v1164_v54  ;;  %v1167_v53 = vadd.f32 %v3367_v18, %v952_v62  ;;  %v1220_v56 = vmax.f32 %v4522_v17, 0.0  ;;  %v745_v62 = vadd.f32 %v4413_v43, %v496_v31  ;;  %v5409_v54 = vld [vmem:[#allocation20_spill] sm:$0xff]  ;;  %v916_v16 = vpop.f32.mrf.mxu1 }
 0x140   :  { %v1071_v37 = vpop.f32.mrf.mxu0  ;;  %v744_v61 = vadd.f32 %v5409_v54, %v491_v10  ;;  %v5410_v18 = vld [vmem:[#allocation4_spill] sm:$0xff]  ;;  %v5417_v10 = vld [vmem:[#allocation3_spill] sm:$0xff] }
 0x141   :  { %v1166_v55 = vadd.f32 %v1071_v37, %v951_v42  ;;  %1273 = vrot.lane.b32.xlu1 %v1220_v56, %s3750_s21  ;;  %1267 = vrot.lane.b32.xlu0 %v1217_v19, %s3750_s21  ;;  %v1219_v35 = vmax.f32 %v4533_v48, 0.0  ;;  %v4561_v41 = vadd.f32 %v4489_v22, %v1167_v53  ;;  %v501_v14 = vadd.f32 %v5411_v11, %v5410_v18  ;;  %v5412_v37 = vld [vmem:[#allocation21_spill] sm:$0xff]  ;;  %v5421_v11 = vld [vmem:[#allocation10_spill] sm:$0xff] }
 0x142   :  { %v3370_v24 = vpop.f32.mrf.mxu0  ;;  %v960_v63 = vadd.f32 %v4484_v58, %v745_v62  ;;  %v959_v1 = vadd.f32 %v4515_v36, %v744_v61  ;;  %v3344_v36 = vpop.f32.mrf.mxu1  ;;  %v5419_v62 = vld [vmem:[#allocation18_spill] sm:$0xff] }
 0x143   :  { %v4564_v27 = vadd.f32 %v4489_v22, %v1166_v55  ;;  %v1169_v57 = vadd.f32 %v3370_v24, %v954_v40  ;;  %v1222_v52 = vmax.f32 %v4561_v41, 0.0  ;;  %v747_v40 = vadd.f32 %v5412_v37, %v506_v9  ;;  %v1429_v41 = vld [vmem:[%s5372_s3 + $0x1d0] sm:$0xff] }
 0x144   :  { %v1081_v30 = vpop.f32.mrf.mxu0 }
 0x145   :  { %v1221_v46 = vmax.f32 %v4564_v27, 0.0  ;;  %v1168_v47 = vadd.f32 %v1081_v30, %v953_v4  ;;  %1271 = vrot.lane.b32.xlu1 %v1219_v35, %s3750_s21  ;;  %v4580_v29 = vadd.f32 %v4489_v22, %v1169_v57  ;;  %v5413_v4 = vld [vmem:[#allocation22_spill] sm:$0xff] }
 0x146   :  { %v3373_v8 = vpop.f32.mrf.mxu0  ;;  %v746_v23 = vadd.f32 %v5413_v4, %v501_v14  ;;  %v5422_v14 = vld [vmem:[#allocation11_spill] sm:$0xff] }
 0x147   :  { %v4583_v20 = vadd.f32 %v4489_v22, %v1168_v47  ;;  %v1171_v45 = vadd.f32 %v3373_v8, %v956_v3  ;;  %1275 = vrot.lane.b32.xlu0 %v1221_v46, %s3750_s21  ;;  %v1224_v42 = vmax.f32 %v4580_v29, 0.0  ;;  %v5414_v3 = vld [vmem:[#allocation7_spill] sm:$0xff] }
 0x148   :  { %v1091_v33 = vpop.f32.mrf.mxu0  ;;  %v511_v47 = vadd.f32 %v5415_v6, %v5414_v3  ;;  %v961_v9 = vadd.f32 %v906_v28, %v746_v23  ;;  %v5423_v28 = vld [vmem:[#allocation17_spill] sm:$0xff]  ;;  %v5426_v3 = vld [vmem:[#allocation8_spill] sm:$0xff]  ;;  %v1428_v29 = vld [vmem:[%s5372_s3 + $0x1c8] sm:$0xff] }
 0x149   :  { %v1223_v39 = vmax.f32 %v4583_v20, 0.0  ;;  %v1170_v51 = vadd.f32 %v1091_v33, %v955_v34  ;;  %1277 = vrot.lane.b32.xlu1 %v1222_v52, %s3750_s21  ;;  %v4611_v25 = vadd.f32 %v4489_v22, %v1171_v45  ;;  %v962_v34 = vadd.f32 %v4543_v2, %v747_v40  ;;  %v5416_v45 = vld [vmem:[#allocation5_spill] sm:$0xff]  ;;  %v926_v40 = vpop.f32.mrf.mxu1 }
 0x14a   :  { %v3376_v0 = vpop.f32.mrf.mxu0  ;;  %v516_v33 = vadd.f32 %v5417_v10, %v5416_v45  ;;  %v5427_v6 = vld [vmem:[#allocation9_spill] sm:$0xff] }
 0x14b   :  { %v4614_v43 = vadd.f32 %v4489_v22, %v1170_v51  ;;  %v1173_v38 = vadd.f32 %v3376_v0, %v958_v59  ;;  %1279 = vrot.lane.b32.xlu0 %v1223_v39, %s3750_s21  ;;  %v1226_v57 = vmax.f32 %v4611_v25, 0.0  ;;  %v5418_v59 = vld [vmem:[#allocation19_spill] sm:$0xff]  ;;  %v1377_v25 = vld [vmem:[%s5372_s3 + $0x30] sm:$0xff] }
 0x14c   :  { %v1101_v53 = vpop.f32.mrf.mxu0  ;;  %v945_v51 = vadd.f32 %v5419_v62, %v5418_v59  ;;  %v5429_v62 = vld [vmem:[#allocation13_spill] sm:$0xff] }
 0x14d   :  { %v1225_v32 = vmax.f32 %v4614_v43, 0.0  ;;  %v1172_v55 = vadd.f32 %v1101_v53, %v957_v12  ;;  %1281 = vrot.lane.b32.xlu1 %v1224_v42, %s3750_s21  ;;  %v4631_v60 = vadd.f32 %v4489_v22, %v1173_v38  ;;  %v5420_v12 = vld [vmem:[#allocation24_spill] sm:$0xff]  ;;  %v521_v53 = vadd.f32 %v5422_v14, %v5421_v11 }
 0x14e   :  { %v3379_v24 = vpop.f32.mrf.mxu0  ;;  %v748_v54 = vadd.f32 %v5420_v12, %v511_v47  ;;  %v1160_v23 = vadd.f32 %v4463_v26, %v945_v51  ;;  %v526_v47 = vadd.f32 %v5427_v6, %v5426_v3  ;;  %v5430_v51 = vld [vmem:[#allocation15_spill] sm:$0xff] }
 0x14f   :  { %v4634_v58 = vadd.f32 %v4489_v22, %v1172_v55  ;;  %v1175_v30 = vadd.f32 %v3379_v24, %v960_v63  ;;  %1283 = vrot.lane.b32.xlu0 %v1225_v32, %s3750_s21  ;;  %v1228_v0 = vmax.f32 %v4631_v60, 0.0  ;;  %v5424_v63 = vld [vmem:[#allocation16_spill] sm:$0xff] }
 0x150   :  { %v1111_v31 = vpop.f32.mrf.mxu0  ;;  %v946_v37 = vadd.f32 %v5424_v63, %v5423_v28  ;;  %v4690_v11 = vadd.f32 %v4489_v22, %v1160_v23  ;;  %v5433_v28 = vld [vmem:[#allocation14_spill] sm:$0xff]  ;;  %v1425_v60 = vld [vmem:[%s5372_s3 + $0x1b0] sm:$0xff] }
 0x151   :  { %v1227_v5 = vmax.f32 %v4634_v58, 0.0  ;;  %v1174_v8 = vadd.f32 %v1111_v31, %v959_v1  ;;  %1285 = vrot.lane.b32.xlu1 %v1226_v57, %s3750_s21  ;;  %v4653_v2 = vadd.f32 %v4489_v22, %v1175_v30  ;;  %v5425_v1 = vld [vmem:[#allocation23_spill] sm:$0xff]  ;;  %v963_v31 = vadd.f32 %v916_v16, %v748_v54  ;;  %v3347_v54 = vpop.f32.mrf.mxu1 }
 0x152   :  { %v3382_v61 = vpop.f32.mrf.mxu0  ;;  %v749_v4 = vadd.f32 %v5425_v1, %v516_v33  ;;  %v1161_v10 = vadd.f32 %v4454_v44, %v946_v37  ;;  %v531_v16 = vadd.f32 %v5430_v51, %v5429_v62  ;;  %v5434_v1 = vld [vmem:[#allocation28_spill] sm:$0xff] }
 0x153   :  { %v4656_v38 = vadd.f32 %v4489_v22, %v1174_v8  ;;  %v1177_v18 = vadd.f32 %v3382_v61, %v962_v34  ;;  %1287 = vrot.lane.b32.xlu0 %v1227_v5, %s3750_s21  ;;  %v5428_v34 = vld [vmem:[#allocation26_spill] sm:$0xff]  ;;  %v1230_v33 = vmax.f32 %v4653_v2, 0.0  ;;  %v936_v6 = vpop.f32.mrf.mxu1 }
 0x154   :  { %v1121_v55 = vpop.f32.mrf.mxu0  ;;  %v750_v8 = vadd.f32 %v5428_v34, %v521_v53  ;;  %v964_v44 = vadd.f32 %v4595_v15, %v749_v4  ;;  %v5432_v53 = vld [vmem:[#allocation12_spill] sm:$0xff]  ;;  %v4700_v3 = vadd.f32 %v4489_v22, %v1161_v10 }
 0x155   :  { %v1229_v24 = vmax.f32 %v4656_v38, 0.0  ;;  %v1176_v30 = vadd.f32 %v1121_v55, %v961_v9  ;;  %1289 = vrot.lane.b32.xlu1 %v1228_v0, %s3750_s21  ;;  %v4677_v26 = vadd.f32 %v4489_v22, %v1177_v18  ;;  %v5431_v9 = vld [vmem:[#allocation25_spill] sm:$0xff]  ;;  %v536_v63 = vadd.f32 %v5433_v28, %v5432_v53 }
 0x156   :  { %v3385_v45 = vpop.f32.mrf.mxu0  ;;  %v751_v12 = vadd.f32 %v5431_v9, %v526_v47  ;;  %v965_v37 = vadd.f32 %v926_v40, %v750_v8  ;;  %v1215_v40 = vmax.f32 %v4690_v11, 0.0  ;;  %v1216_v51 = vmax.f32 %v4700_v3, 0.0  ;;  %v1374_v38 = vld [vmem:[%s5372_s3 + $0x18] sm:$0xff] }
 0x157   :  { %v4680_v59 = vadd.f32 %v4489_v22, %v1176_v30  ;;  %1291 = vrot.lane.b32.xlu0 %v1229_v24, %s3750_s21  ;;  %v752_v30 = vadd.f32 %v5434_v1, %v531_v16  ;;  %v1232_v15 = vmax.f32 %v4677_v26, 0.0  ;;  %v1179_v4 = vadd.f32 %v3385_v45, %v964_v44  ;;  %v1418_v11 = vld [vmem:[%s5372_s3 + $0x178] sm:$0xf] }
 0x158   :  { %v1131_v61 = vpop.f32.mrf.mxu0  ;;  %v966_v23 = vadd.f32 %v3344_v36, %v751_v12 }
 0x159   :  { %v1231_v18 = vmax.f32 %v4680_v59, 0.0  ;;  %v1178_v14 = vadd.f32 %v1131_v61, %v963_v31  ;;  %1293 = vrot.lane.b32.xlu1 %v1230_v33, %s3750_s21  ;;  %v5435_v31 = vld [vmem:[#allocation27_spill] sm:$0xff]  ;;  %v967_v10 = vadd.f32 %v936_v6, %v752_v30  ;;  %v4716_v36 = vadd.f32 %v4489_v22, %v1179_v4 }
 0x15a   :  { %v3388_v55 = vpop.f32.mrf.mxu0  ;;  %v753_v34 = vadd.f32 %v5435_v31, %v536_v63  ;;  %v1372_v59 = vld [vmem:[%s5372_s3 + $0x8] sm:$0xff] }
 0x15b   :  { %1295 = vrot.lane.b32.xlu0 %v1231_v18, %s3750_s21  ;;  %v4709_v8 = vadd.f32 %v4489_v22, %v1178_v14  ;;  %v1181_v16 = vadd.f32 %v3388_v55, %v966_v23  ;;  %v1234_v53 = vmax.f32 %v4716_v36, 0.0  ;;  %v1416_v36 = vld [vmem:[%s5372_s3 + $0x168] sm:$0xff] }
 0x15c   :  { %v1141_v47 = vpop.f32.mrf.mxu0  ;;  %v968_v12 = vadd.f32 %v3347_v54, %v753_v34 }
 0x15d   :  { %v1180_v62 = vadd.f32 %v1141_v47, %v965_v37  ;;  %1297 = vrot.lane.b32.xlu1 %v1232_v15, %s3750_s21  ;;  %v1233_v61 = vmax.f32 %v4709_v8, 0.0  ;;  %v4730_v28 = vadd.f32 %v4489_v22, %v1181_v16 }
 0x15e   :  { %v3391_v45 = vpop.f32.mrf.mxu0 }
 0x15f   :  { %1263 = vrot.lane.b32.xlu0 %v1215_v40, %s3750_s21  ;;  %v4723_v44 = vadd.f32 %v4489_v22, %v1180_v62  ;;  %v1183_v63 = vadd.f32 %v3391_v45, %v968_v12  ;;  %v1236_v55 = vmax.f32 %v4730_v28, 0.0 }
 0x160   :  { %v1151_v9 = vpop.f32.mrf.mxu0 }
 0x161   :  { %v1182_v14 = vadd.f32 %v1151_v9, %v967_v10  ;;  %1265 = vrot.lane.b32.xlu1 %v1216_v51, %s3750_s21  ;;  %v1235_v54 = vmax.f32 %v4723_v44, 0.0  ;;  %v4744_v1 = vadd.f32 %v4489_v22, %v1183_v63 }
 0x163   :  { %1299 = vrot.lane.b32.xlu0 %v1233_v61, %s3750_s21  ;;  %v4737_v37 = vadd.f32 %v4489_v22, %v1182_v14  ;;  %v1238_v4 = vmax.f32 %v4744_v1, 0.0  ;;  %v1427_v14 = vld [vmem:[%s5372_s3 + $0x1c0] sm:$0xff] }
 0x165   :  { %1301 = vrot.lane.b32.xlu1 %v1234_v53, %s3750_s21  ;;  %v1237_v30 = vmax.f32 %v4737_v37, 0.0  ;;  %v1407_v37 = vld [vmem:[%s5372_s3 + $0x120] sm:$0xff] }
 0x167   :  { %1303 = vrot.lane.b32.xlu0 %v1235_v54, %s3750_s21 }
 0x169   :  { %1305 = vrot.lane.b32.xlu1 %v1236_v55, %s3750_s21 }
 0x16b   :  { %1307 = vrot.lane.b32.xlu0 %v1237_v30, %s3750_s21 }
 0x16d   :  { %1309 = vrot.lane.b32.xlu1 %v1238_v4, %s3750_s21 }
 0x1af   :  { %v1270_v22 = vpop.permute.xlu0 %1269 }
 0x1b0   :  { %v1338_v47 = vmax.f32 %v1218_v21, %v1270_v22 }
 0x1b3   :  { %v1274_v23 = vpop.permute.xlu1 %1273  ;;  %v1268_v6 = vpop.permute.xlu0 %1267 }
 0x1b4   :  { %v1337_v31 = vmax.f32 %v1217_v19, %v1268_v6  ;;  %v1340_v45 = vmax.f32 %v1220_v56, %v1274_v23  ;;  %v1380_v56 = vld [vmem:[%s5372_s3 + $0x48] sm:$0xff] }
 0x1b5   :  { %v1376_v6 = vld [vmem:[%s5372_s3 + $0x28] sm:$0xff] }
 0x1b6   :  { %v4764_v34 = vmax.f32 %v1337_v31, %v1338_v47 }
 0x1b7   :  { %v1272_v62 = vpop.permute.xlu1 %1271 }
 0x1b8   :  { %v1339_v10 = vmax.f32 %v1219_v35, %v1272_v62  ;;  %3416 = vmatprep.mubr.msk.f32.mxu1 %vm1431_vm2, %v4764_v34 }
 0x1b9   :  { %v1276_v16 = vpop.permute.xlu0 %1275 }
 0x1ba   :  { %v4772_v9 = vmax.f32 %v1339_v10, %v1340_v45  ;;  %v1341_v21 = vmax.f32 %v1221_v46, %v1276_v16  ;;  %v1424_v45 = vld [vmem:[%s5372_s3 + $0x1a8] sm:$0xff] }
 0x1bb   :  { %v1278_v49 = vpop.permute.xlu1 %1277 }
 0x1bc   :  { %v1342_v17 = vmax.f32 %v1222_v52, %v1278_v49  ;;  %3417 = vmatmul.mubr.msk.f32.vlgmr.msra.gmra.mxu1 %vm1431_vm2, %v4772_v9  ;;  %3488 = vmatprep.mubr.msk.f32.mxu0 %vm1431_vm2, %v4772_v9 }
 0x1bd   :  { %v1280_v19 = vpop.permute.xlu0 %1279  ;;  %3429 = vmatpush3.msk.msra.mxu1 %vm159_vm0, %v4539_v13  ;;  %v1379_v13 = vld [vmem:[%s5372_s3 + $0x40] sm:$0xff] }
 0x1be   :  { %v4787_v48 = vmax.f32 %v1341_v21, %v1342_v17  ;;  %3430 = vmatprep.subr.mxu1 %v1381_v50  ;;  %v1343_v27 = vmax.f32 %v1223_v39, %v1280_v19 }
 0x1bf   :  { %v1282_v35 = vpop.permute.xlu1 %1281  ;;  %3431 = vmatpush3.msra.mxu1 %v1381_v50  ;;  %v1423_v50 = vld [vmem:[%s5372_s3 + $0x1a0] sm:$0xff] }
 0x1c0   :  { %v1344_v46 = vmax.f32 %v1224_v42, %v1282_v35  ;;  %3419 = vmatprep.mubr.msk.f32.mxu1 %vm1431_vm2, %v4787_v48  ;;  %3489 = vmatmul.mubr.msk.f32.vlgmr.msra.gmra.mxu0 %vm1431_vm2, %v4787_v48  ;;  %v1378_v42 = vld [vmem:[%s5372_s3 + $0x38] sm:$0xff] }
 0x1c1   :  { %v1284_v52 = vpop.permute.xlu0 %1283  ;;  %3432 = vmatprep.subr.mxu1 %v1380_v56  ;;  %3537 = vmatpush3.msk.msra.mxu0 %vm159_vm0, %v4591_v7 }
 0x1c2   :  { %v4808_v20 = vmax.f32 %v1343_v27, %v1344_v46  ;;  %3433 = vmatpush3.msra.mxu1 %v1380_v56  ;;  %3538 = vmatprep.subr.mxu0 %v1429_v41  ;;  %v1345_v12 = vmax.f32 %v1225_v32, %v1284_v52  ;;  %v1426_v32 = vld [vmem:[%s5372_s3 + $0x1b8] sm:$0xff]  ;;  %v1417_v27 = vld [vmem:[%s5372_s3 + $0x170] sm:$0xff] }
 0x1c3   :  { %v1286_v39 = vpop.permute.xlu1 %1285  ;;  %3434 = vmatprep.subr.mxu1 %v1379_v13  ;;  %3539 = vmatpush3.msra.mxu0 %v1429_v41  ;;  %v1422_v56 = vld [vmem:[%s5372_s3 + $0x198] sm:$0xff]  ;;  %v1421_v46 = vld [vmem:[%s5372_s3 + $0x190] sm:$0xff] }
 0x1c4   :  { %v1346_v7 = vmax.f32 %v1226_v57, %v1286_v39  ;;  %3420 = vmatmul.mubr.msk.f32.gmra.mxu1 %vm1431_vm2, %v4808_v20  ;;  %3491 = vmatprep.mubr.msk.f32.mxu0 %vm1431_vm2, %v4808_v20  ;;  %v1412_v39 = vld [vmem:[%s5372_s3 + $0x148] sm:$0xff] }
 0x1c5   :  { %v1288_v63 = vpop.permute.xlu0 %1287  ;;  %3435 = vmatpush3.msra.mxu1 %v1379_v13  ;;  %3540 = vmatprep.subr.mxu0 %v1428_v29  ;;  %v1414_v13 = vld [vmem:[%s5372_s3 + $0x158] sm:$0xff] }
 0x1c6   :  { %v4827_v22 = vmax.f32 %v1345_v12, %v1346_v7  ;;  %3436 = vmatprep.subr.mxu1 %v1378_v42  ;;  %3541 = vmatpush3.msra.mxu0 %v1428_v29  ;;  %v1347_v57 = vmax.f32 %v1227_v5, %v1288_v63  ;;  %v1375_v5 = vld [vmem:[%s5372_s3 + $0x20] sm:$0xff]  ;;  %v1413_v29 = vld [vmem:[%s5372_s3 + $0x150] sm:$0xff] }
 0x1c7   :  { %v1290_v43 = vpop.permute.xlu1 %1289  ;;  %3437 = vmatpush3.msra.mxu1 %v1378_v42  ;;  %3542 = vmatprep.subr.mxu0 %v1427_v14  ;;  %v1411_v7 = vld [vmem:[%s5372_s3 + $0x140] sm:$0xff] }
 0x1c8   :  { %v1348_v23 = vmax.f32 %v1228_v0, %v1290_v43  ;;  %3422 = vmatprep.mubr.msk.f32.mxu1 %vm1431_vm2, %v4827_v22  ;;  %3492 = vmatmul.mubr.msk.f32.gmra.mxu0 %vm1431_vm2, %v4827_v22  ;;  %v2118_v43 = vld [vmem:[%s5374_s5 + $0x98] sm:$0xff] }
 0x1c9   :  { %v1292_v47 = vpop.permute.xlu0 %1291  ;;  %3438 = vmatprep.subr.mxu1 %v1377_v25  ;;  %3543 = vmatpush3.msra.mxu0 %v1427_v14 }
 0x1ca   :  { %v4846_v31 = vmax.f32 %v1347_v57, %v1348_v23  ;;  %3439 = vmatpush3.msra.mxu1 %v1377_v25  ;;  %3544 = vmatprep.subr.mxu0 %v1426_v32  ;;  %v1349_v0 = vmax.f32 %v1229_v24, %v1292_v47  ;;  %v2129_v57 = vld [vmem:[%s5374_s5 + $0xf0] sm:$0xff]  ;;  %v2116_v47 = vld [vmem:[%s5374_s5 + $0x88] sm:$0xff] }
 0x1cb   :  { %v1294_v58 = vpop.permute.xlu1 %1293  ;;  %3440 = vmatprep.subr.mxu1 %v1376_v6  ;;  %3545 = vmatpush3.msra.mxu0 %v1426_v32  ;;  %v2130_v32 = vld [vmem:[%s5374_s5 + $0xf8] sm:$0xff]  ;;  %v2117_v23 = vld [vmem:[%s5374_s5 + $0x90] sm:$0xff] }
 0x1cc   :  { %v1350_v62 = vmax.f32 %v1230_v33, %v1294_v58  ;;  %3423 = vmatmul.mubr.msk.f32.gmra.mxu1 %vm1431_vm2, %v4846_v31  ;;  %3494 = vmatprep.mubr.msk.f32.mxu0 %vm1431_vm2, %v4846_v31  ;;  %v1373_v33 = vld [vmem:[%s5372_s3 + $0x10] sm:$0xff] }
 0x1cd   :  { %3441 = vmatpush3.msra.mxu1 %v1376_v6  ;;  %v1296_v10 = vpop.permute.xlu0 %1295  ;;  %3546 = vmatprep.subr.mxu0 %v1425_v60  ;;  %v2128_v6 = vld [vmem:[%s5374_s5 + $0xe8] sm:$0xff]  ;;  %v2113_v58 = vld [vmem:[%s5374_s5 + $0x70] sm:$0xff] }
 0x1ce   :  { %v4868_v24 = vmax.f32 %v1349_v0, %v1350_v62  ;;  %3442 = vmatprep.subr.mxu1 %v1375_v5  ;;  %3547 = vmatpush3.msra.mxu0 %v1425_v60  ;;  %v1351_v16 = vmax.f32 %v1231_v18, %v1296_v10  ;;  %v2114_v60 = vld [vmem:[%s5374_s5 + $0x78] sm:$0xff] }
 0x1cf   :  { %v1298_v2 = vpop.permute.xlu1 %1297  ;;  %3443 = vmatpush3.msra.mxu1 %v1375_v5  ;;  %3548 = vmatprep.subr.mxu0 %v1424_v45 }
 0x1d0   :  { %v1352_v49 = vmax.f32 %v1232_v15, %v1298_v2  ;;  %3425 = vmatprep.mubr.msk.f32.mxu1 %vm1431_vm2, %v4868_v24  ;;  %3444 = vmatprep.subr.mxu1 %v1374_v38  ;;  %v1371_v15 = vld [vmem:[%s5372_s3] sm:$0xff] }
 0x1d1   :  { %3495 = vmatmul.mubr.msk.f32.gmra.mxu0 %vm1431_vm2, %v4868_v24  ;;  %3445 = vmatpush3.msra.mxu1 %v1374_v38  ;;  %v1264_v21 = vpop.permute.xlu0 %1263 }
 0x1d2   :  { %v4887_v18 = vmax.f32 %v1351_v16, %v1352_v49  ;;  %3446 = vmatprep.subr.mxu1 %v1373_v33  ;;  %3549 = vmatpush3.msra.mxu0 %v1424_v45  ;;  %v1335_v17 = vmax.f32 %v1215_v40, %v1264_v21 }
 0x1d3   :  { %v1266_v26 = vpop.permute.xlu1 %1265  ;;  %3447 = vmatpush3.msra.mxu1 %v1373_v33  ;;  %3550 = vmatprep.subr.mxu0 %v1423_v50 }
 0x1d4   :  { %v1336_v19 = vmax.f32 %v1216_v51, %v1266_v26  ;;  %3426 = vmatmul.mubr.msk.f32.gmra.mxu1 %vm1431_vm2, %v4887_v18  ;;  %3448 = vmatprep.subr.mxu1 %v1372_v59 }
 0x1d5   :  { %3497 = vmatprep.mubr.msk.f32.mxu0 %vm1431_vm2, %v4887_v18  ;;  %3449 = vmatpush3.msra.mxu1 %v1372_v59  ;;  %v1300_v35 = vpop.permute.xlu0 %1299 }
 0x1d6   :  { %v1359_v40 = vmax.f32 %v1335_v17, %v1336_v19  ;;  %3450 = vmatprep.subr.mxu1 %v1371_v15  ;;  %3551 = vmatpush3.msra.mxu0 %v1423_v50  ;;  %v1353_v51 = vmax.f32 %v1233_v61, %v1300_v35  ;;  %v1420_v61 = vld [vmem:[%s5372_s3 + $0x188] sm:$0xff] }
 0x1d7   :  { %v1302_v3 = vpop.permute.xlu1 %1301  ;;  %3451 = vmatpush3.msra.mxu1 %v1371_v15  ;;  %3552 = vmatprep.subr.mxu0 %v1422_v56 }
 0x1d8   :  { %v1354_v41 = vmax.f32 %v1234_v53, %v1302_v3  ;;  %3452 = vmatprep.mubr.msk.f32.mxu1 %vm1431_vm2, %v1359_v40  ;;  %3500 = vmatprep.subr.msk.mxu1 %vm159_vm0, %v1418_v11  ;;  %v1415_v53 = vld [vmem:[%s5372_s3 + $0x160] sm:$0xff] }
 0x1d9   :  { %3453 = vmatmul.mubr.msk.f32.vlgmr.msra.gmra.mxu1 %vm1431_vm2, %v4764_v34  ;;  %3553 = vmatpush3.msra.mxu0 %v1422_v56  ;;  %v1419_v34 = vld [vmem:[%s5372_s3 + $0x180] sm:$0xff]  ;;  %v1304_v52 = vpop.permute.xlu0 %1303 }
 0x1da   :  { %v4920_v8 = vmax.f32 %v1353_v51, %v1354_v41  ;;  %3501 = vmatpush3.msk.msra.mxu1 %vm159_vm0, %v1418_v11  ;;  %3455 = vmatprep.mubr.msk.f32.mxu1 %vm1431_vm2, %v4772_v9  ;;  %v1355_v14 = vmax.f32 %v1235_v54, %v1304_v52  ;;  %v1409_v54 = vld [vmem:[%s5372_s3 + $0x130] sm:$0xff] }
 0x1db   :  { %3502 = vmatprep.subr.mxu1 %v1417_v27  ;;  %3554 = vmatprep.subr.mxu0 %v1421_v46  ;;  %v1306_v9 = vpop.permute.xlu1 %1305 }
 0x1dc   :  { %3503 = vmatpush3.msra.mxu1 %v1417_v27  ;;  %3555 = vmatpush3.msra.mxu0 %v1421_v46  ;;  %v1356_v42 = vmax.f32 %v1236_v55, %v1306_v9  ;;  %v1410_v55 = vld [vmem:[%s5372_s3 + $0x138] sm:$0xff] }
 0x1dd   :  { %3498 = vmatmul.mubr.msk.f32.gmra.mxu0 %vm1431_vm2, %v4920_v8  ;;  %3504 = vmatprep.subr.mxu1 %v1416_v36  ;;  %v1308_v63 = vpop.permute.xlu0 %1307 }
 0x1de   :  { %3556 = vmatprep.subr.mxu0 %v1420_v61  ;;  %3456 = vmatmul.mubr.msk.f32.gmra.mxu1 %vm1431_vm2, %v4787_v48  ;;  %v1369_v25 = vmax.f32 %v1355_v14, %v1356_v42  ;;  %v1357_v44 = vmax.f32 %v1237_v30, %v1308_v63  ;;  %v3751_v30 = vmov 0.0  }
 0x1df   :  { %3505 = vmatpush3.msra.mxu1 %v1416_v36  ;;  %3557 = vmatpush3.msra.mxu0 %v1420_v61  ;;  %v1310_v12 = vpop.permute.xlu1 %1309  ;;  %v2112_v61 = vld [vmem:[%s5374_s5 + $0x68] sm:$0xff] }
 0x1e0   :  { %3560 = vmatprep.mubr.msk.f32.mxu0 %vm1431_vm2, %v4808_v20  ;;  %3458 = vmatprep.mubr.msk.f32.mxu1 %vm1431_vm2, %v4808_v20  ;;  %v1358_v28 = vmax.f32 %v1238_v4, %v1310_v12  ;;  %v1408_v4 = vld [vmem:[%s5372_s3 + $0x128] sm:$0xff]  ;;  %v2126_v12 = vld [vmem:[%s5374_s5 + $0xd8] sm:$0xff] }
 0x1e1   :  { %3506 = vmatprep.subr.mxu1 %v1415_v53  ;;  %3558 = vmatprep.subr.mxu0 %v1419_v34 }
 0x1e2   :  { %3507 = vmatpush3.msra.mxu1 %v1415_v53  ;;  %3559 = vmatpush3.msra.mxu0 %v1419_v34  ;;  %v1370_v1 = vmax.f32 %v1357_v44, %v1358_v28  ;;  %v2110_v28 = vld [vmem:[%s5374_s5 + $0x58] sm:$0xff] }
 0x1e3   :  { %3508 = vmatprep.subr.mxu1 %v1414_v13  ;;  %3561 = vmatmul.mubr.msk.f32.vlgmr.msra.gmra.mxu0 %vm1431_vm2, %v4827_v22 }
 0x1e4   :  { %3459 = vmatmul.mubr.msk.f32.gmra.mxu1 %vm1431_vm2, %v4827_v22  ;;  %3563 = vmatprep.mubr.msk.f32.mxu0 %vm1431_vm2, %v4846_v31 }
 0x1e5   :  { %3509 = vmatpush3.msra.mxu1 %v1414_v13  ;;  %3461 = vmatprep.mubr.msk.f32.mxu1 %vm1431_vm2, %v4846_v31  ;;  %v2127_v13 = vld [vmem:[%s5374_s5 + $0xe0] sm:$0xff] }
 0x1e6   :  { %3510 = vmatprep.subr.mxu1 %v1413_v29  ;;  %3622 = vmatprep.subr.mxu0 %v3751_v30 }
 0x1e7   :  { %3511 = vmatpush3.msra.mxu1 %v1413_v29  ;;  %3564 = vmatmul.mubr.msk.f32.gmra.mxu0 %vm1431_vm2, %v4868_v24  ;;  %v2111_v29 = vld [vmem:[%s5374_s5 + $0x60] sm:$0xff] }
 0x1e8   :  { %3512 = vmatprep.subr.mxu1 %v1412_v39  ;;  %3462 = vmatmul.mubr.msk.f32.gmra.mxu1 %vm1431_vm2, %v4868_v24 }
 0x1e9   :  { %3513 = vmatpush3.msra.mxu1 %v1412_v39  ;;  %3566 = vmatprep.mubr.msk.f32.mxu0 %vm1431_vm2, %v4887_v18 }
 0x1ea   :  { %3514 = vmatprep.subr.mxu1 %v1411_v7  ;;  %3524 = vmatprep.mubr.msk.f32.mxu1 %vm1431_vm2, %v4787_v48  ;;  %v2120_v48 = vld [vmem:[%s5374_s5 + $0xa8] sm:$0xf] }
 0x1eb   :  { %3515 = vmatpush3.msra.mxu1 %v1411_v7  ;;  %3567 = vmatmul.mubr.msk.f32.gmra.mxu0 %vm1431_vm2, %v4920_v8 }
 0x1ec   :  { %3516 = vmatprep.subr.mxu1 %v1410_v55  ;;  %3569 = vmatprep.mubr.msk.f32.mxu0 %vm1431_vm2, %v1369_v25 }
 0x1ed   :  { %3517 = vmatpush3.msra.mxu1 %v1410_v55 }
 0x1ee   :  { %3518 = vmatprep.subr.mxu1 %v1409_v54 }
 0x1ef   :  { %3519 = vmatpush3.msra.mxu1 %v1409_v54  ;;  %3570 = vmatmul.mubr.msk.f32.gmra.mxu0 %vm1431_vm2, %v1370_v1  ;;  %v2125_v54 = vld [vmem:[%s5374_s5 + $0xd0] sm:$0xff] }
 0x1f0   :  { %3520 = vmatprep.subr.mxu1 %v1408_v4  ;;  %3644 = vmatprep.mubr.msk.f32.mxu0 %vm3752_vm3, %v3751_v30 }
 0x1f1   :  { %3521 = vmatpush3.msra.mxu1 %v1408_v4 }
 0x1f2   :  { %3522 = vmatprep.subr.mxu1 %v1407_v37 }
 0x1f3   :  { %3523 = vmatpush3.msra.mxu1 %v1407_v37 }
 0x1f4   :  { %3525 = vmatmul.mubr.msk.f32.vlgmr.msra.gmra.mxu1 %vm1431_vm2, %v4808_v20  ;;  %3572 = vmatprep.subr.mxu1 %v3751_v30  ;;  %v2119_v20 = vld [vmem:[%s5374_s5 + $0xa0] sm:$0xff] }
 0x1f5   :  { %3527 = vmatprep.mubr.msk.f32.mxu1 %vm1431_vm2, %v4827_v22  ;;  %3573 = vmatpush3.msk.msra.mxu1 %vm159_vm0, %v2120_v48  ;;  %v2131_v22 = vld [vmem:[%s5374_s5 + $0x100] sm:$0xf] }
 0x1f6   :  { %3574 = vmatprep.subr.mxu1 %v3751_v30  ;;  %3623 = vmatpush3.msk.msra.mxu0 %vm159_vm0, %v2131_v22 }
 0x1f7   :  { %3575 = vmatpush3.msra.mxu1 %v2119_v20  ;;  %3624 = vmatprep.subr.mxu0 %v3751_v30 }
 0x1f8   :  { %3528 = vmatmul.mubr.msk.f32.gmra.mxu1 %vm1431_vm2, %v4846_v31  ;;  %3576 = vmatprep.subr.mxu1 %v3751_v30  ;;  %v2115_v31 = vld [vmem:[%s5374_s5 + $0x80] sm:$0xff] }
 0x1f9   :  { %3530 = vmatprep.mubr.msk.f32.mxu1 %vm1431_vm2, %v4868_v24  ;;  %3625 = vmatpush3.msra.mxu0 %v2130_v32 }
 0x1fa   :  { %3577 = vmatpush3.msra.mxu1 %v2118_v43  ;;  %3626 = vmatprep.subr.mxu0 %v3751_v30 }
 0x1fb   :  { %3578 = vmatprep.subr.mxu1 %v3751_v30  ;;  %3627 = vmatpush3.msra.mxu0 %v2129_v57 }
 0x1fc   :  { %3531 = vmatmul.mubr.msk.f32.gmra.mxu1 %vm1431_vm2, %v4887_v18  ;;  %3628 = vmatprep.subr.mxu0 %v3751_v30 }
 0x1fd   :  { %3533 = vmatprep.mubr.msk.f32.mxu1 %vm1431_vm2, %v4920_v8  ;;  %3579 = vmatpush3.msra.mxu1 %v2117_v23  ;;  %v2839_v23 = vld [vmem:[%s5375_s4] ss:$0 sm:$0xff] }
 0x1fe   :  { %3580 = vmatprep.subr.mxu1 %v3751_v30  ;;  %3629 = vmatpush3.msra.mxu0 %v2128_v6  ;;  %v2124_v6 = vld [vmem:[%s5374_s5 + $0xc8] sm:$0xff] }
 0x1ff   :  { %3581 = vmatpush3.msra.mxu1 %v2116_v47  ;;  %3630 = vmatprep.subr.mxu0 %v3751_v30 }
 0x200   :  { %3534 = vmatmul.mubr.msk.f32.gmra.mxu1 %vm1431_vm2, %v1369_v25  ;;  %3582 = vmatprep.subr.mxu1 %v3751_v30 }
 0x201   :  { %3583 = vmatpush3.msra.mxu1 %v2115_v31  ;;  %3631 = vmatpush3.msra.mxu0 %v2127_v13 }
 0x202   :  { %3584 = vmatprep.subr.mxu1 %v3751_v30  ;;  %3632 = vmatprep.subr.mxu0 %v3751_v30 }
 0x203   :  { %3585 = vmatpush3.msra.mxu1 %v2114_v60  ;;  %3633 = vmatpush3.msra.mxu0 %v2126_v12 }
 0x204   :  { %3586 = vmatprep.subr.mxu1 %v3751_v30  ;;  %3634 = vmatprep.subr.mxu0 %v3751_v30 }
 0x205   :  { %3587 = vmatpush3.msra.mxu1 %v2113_v58  ;;  %3594 = vmatprep.mubr.msk.f32.mxu1 %vm3752_vm3, %v3751_v30 }
 0x206   :  { %3588 = vmatprep.subr.mxu1 %v3751_v30  ;;  %3635 = vmatpush3.msra.mxu0 %v2125_v54 }
 0x207   :  { %3589 = vmatpush3.msra.mxu1 %v2112_v61  ;;  %3636 = vmatprep.subr.mxu0 %v3751_v30 }
 0x208   :  { %3590 = vmatprep.subr.mxu1 %v3751_v30  ;;  %3637 = vmatpush3.msra.mxu0 %v2124_v6  ;;  %v2100_v6 = vld [vmem:[%s5374_s5 + $0x8] sm:$0xff] }
 0x209   :  { %3591 = vmatpush3.msra.mxu1 %v2111_v29  ;;  %3638 = vmatprep.subr.mxu0 %v3751_v30 }
 0x20a   :  { %3592 = vmatprep.subr.mxu1 %v3751_v30 }
 0x20b   :  { %3593 = vmatpush3.msra.mxu1 %v2110_v28 }
 0x20c   :  { %3597 = vmatprep.subr.mxu1 %v3751_v30 }
 0x27c   :  { %v3418_v5 = vpop.f32.mrf.mxu1 }
 0x27e   :  { %v1525_v0 = vpop.f32.mrf.mxu1 }
 0x280   :  { %v3490_v10 = vpop.f32.mrf.mxu0 }
 0x282   :  { %v1747_v24 = vpop.f32.mrf.mxu0 }
 0x284   :  { %v3421_v62 = vpop.f32.mrf.mxu1 }
 0x286   :  { %v1535_v45 = vpop.f32.mrf.mxu1 }
 0x288   :  { %v3493_v33 = vpop.f32.mrf.mxu0 }
 0x28a   :  { %v1757_v50 = vpop.f32.mrf.mxu0 }
 0x28c   :  { %v3424_v38 = vpop.f32.mrf.mxu1 }
 0x28e   :  { %v1545_v2 = vpop.f32.mrf.mxu1 }
 0x291   :  { %v3496_v59 = vpop.f32.mrf.mxu0 }
 0x293   :  { %v5064_v26 = vpop.f32.mrf.mxu0 }
 0x294   :  { %v3427_v16 = vpop.f32.mrf.mxu1 }
 0x296   :  { %v5062_v49 = vpop.f32.mrf.mxu1 }
 0x299   :  { %v3454_v21 = vpop.f32.mrf.mxu1 }
 0x29a   :  { %v1642_v41 = vadd.f32 %v3454_v21, %v3418_v5  ;;  %v2122_v21 = vld [vmem:[%s5374_s5 + $0xb8] sm:$0xff] }
 0x29b   :  { %v1636_v18 = vpop.f32.mrf.mxu1 }
 0x29c   :  { %v1637_v8 = vadd.f32 %v1636_v18, %v1525_v0  ;;  %v1787_v34 = vadd.f32 %v3490_v10, %v1642_v41  ;;  %v2123_v10 = vld [vmem:[%s5374_s5 + $0xc0] sm:$0xff] }
 0x29d   :  { %v5066_v17 = vpop.f32.mrf.mxu0  ;;  %3639 = vmatpush3.msra.mxu0 %v2123_v10  ;;  %v2137_v10 = vld [vmem:[%s5374_s5 + $0x130] sm:$0xff] }
 0x29e   :  { %v3457_v15 = vpop.f32.mrf.mxu1  ;;  %v1786_v14 = vadd.f32 %v1747_v24, %v1637_v8  ;;  %3640 = vmatprep.subr.mxu0 %v3751_v30 }
 0x29f   :  { %v5068_v56 = vpop.f32.mrf.mxu0  ;;  %v1652_v36 = vadd.f32 %v3457_v15, %v3421_v62  ;;  %3641 = vmatpush3.msra.mxu0 %v2122_v21 }
 0x2a0   :  { %v1646_v19 = vpop.f32.mrf.mxu1  ;;  %3642 = vmatprep.subr.mxu0 %v3751_v30 }
 0x2a1   :  { %v1647_v52 = vadd.f32 %v1646_v19, %v1535_v45  ;;  %v1789_v63 = vadd.f32 %v3493_v33, %v1652_v36 }
 0x2a3   :  { %v3562_v11 = vpop.f32.mrf.mxu0  ;;  %v1788_v37 = vadd.f32 %v1757_v50, %v1647_v52 }
 0x2a4   :  { %v3460_v35 = vpop.f32.mrf.mxu1 }
 0x2a5   :  { %v1985_v3 = vpop.f32.mrf.mxu0  ;;  %v1662_v7 = vadd.f32 %v3460_v35, %v3424_v38 }
 0x2a6   :  { %v1656_v40 = vpop.f32.mrf.mxu1 }
 0x2a7   :  { %v3565_v27 = vpop.f32.mrf.mxu0  ;;  %v1657_v55 = vadd.f32 %v1656_v40, %v1545_v2  ;;  %v1791_v57 = vadd.f32 %v3496_v59, %v1662_v7 }
 0x2a8   :  { %v3463_v51 = vpop.f32.mrf.mxu1 }
 0x2a9   :  { %v1995_v53 = vpop.f32.mrf.mxu0  ;;  %v1672_v48 = vadd.f32 %v3463_v51, %v3427_v16  ;;  %v1790_v58 = vadd.f32 %v5064_v26, %v1657_v55  ;;  %v2108_v55 = vld [vmem:[%s5374_s5 + $0x48] sm:$0xff] }
 0x2aa   :  { %v1666_v46 = vpop.f32.mrf.mxu1 }
 0x2ab   :  { %v3568_v25 = vpop.f32.mrf.mxu0  ;;  %v1667_v47 = vadd.f32 %v1666_v46, %v5062_v49  ;;  %v1793_v24 = vadd.f32 %v5066_v17, %v1672_v48 }
 0x2ad   :  { %v2005_v31 = vpop.f32.mrf.mxu0  ;;  %v1792_v26 = vadd.f32 %v5068_v56, %v1667_v47 }
 0x2af   :  { %v3571_v59 = vpop.f32.mrf.mxu0 }
 0x2b4   :  { %v3526_v9 = vpop.f32.mrf.mxu1 }
 0x2b5   :  { %v1906_v39 = vadd.f32 %v3526_v9, %v1787_v34 }
 0x2b6   :  { %v1866_v42 = vpop.f32.mrf.mxu1 }
 0x2b7   :  { %v1905_v1 = vadd.f32 %v1866_v42, %v1786_v14  ;;  %v2025_v20 = vadd.f32 %v3562_v11, %v1906_v39  ;;  %v2121_v11 = vld [vmem:[%s5374_s5 + $0xb0] sm:$0xff] }
 0x2b8   :  { %v3529_v44 = vpop.f32.mrf.mxu1  ;;  %3643 = vmatpush3.msra.mxu0 %v2121_v11  ;;  %v2468_v11 = vld [vmem:[%s5376_s7 + $0x48] sm:$0xff] }
 0x2b9   :  { %v1908_v4 = vadd.f32 %v3529_v44, %v1789_v63  ;;  %v2024_v5 = vadd.f32 %v1985_v3, %v1905_v1  ;;  %v5111_v2 = vadd.f32 %v2839_v23, %v2025_v20  ;;  %3672 = vmatprep.subr.mxu0 %v3751_v30  ;;  %v2109_v63 = vld [vmem:[%s5374_s5 + $0x50] sm:$0xf]  ;;  %v2107_v44 = vld [vmem:[%s5374_s5 + $0x40] sm:$0xff] }
 0x2ba   :  { %v1876_v22 = vpop.f32.mrf.mxu1  ;;  %v2105_v20 = vld [vmem:[%s5374_s5 + $0x30] sm:$0xff] }
 0x2bb   :  { %v2027_v43 = vadd.f32 %v3565_v27, %v1908_v4  ;;  %v1907_v32 = vadd.f32 %v1876_v22, %v1788_v37  ;;  %v5118_v35 = vadd.f32 %v2839_v23, %v2024_v5  ;;  %v2048_v56 = vmax.f32 %v5111_v2, 0.0  ;;  %v2015_v27 = vpop.f32.mrf.mxu0  ;;  %v2106_v37 = vld [vmem:[%s5374_s5 + $0x38] sm:$0xff]  ;;  %v2104_v22 = vld [vmem:[%s5374_s5 + $0x28] sm:$0xff]  ;;  %v2141_v5 = vld [vmem:[%s5374_s5 + $0x150] sm:$0xff] }
 0x2bc   :  { %v3532_v60 = vpop.f32.mrf.mxu1 }
 0x2bd   :  { %v2026_v0 = vadd.f32 %v1995_v53, %v1907_v32  ;;  %v1910_v62 = vadd.f32 %v3532_v60, %v1791_v57  ;;  %v2042_v45 = vadd.f32 %v2839_v23, %v2027_v43  ;;  %v2047_v8 = vmax.f32 %v5118_v35, 0.0  ;;  %v2103_v43 = vld [vmem:[%s5374_s5 + $0x20] sm:$0xff]  ;;  %v2102_v32 = vld [vmem:[%s5374_s5 + $0x18] sm:$0xff]  ;;  %v2101_v57 = vld [vmem:[%s5374_s5 + $0x10] sm:$0xff] }
 0x2be   :  { %v1886_v38 = vpop.f32.mrf.mxu1  ;;  %v2469_v35 = vld [vmem:[%s5376_s7 + $0x50] sm:$0xff] }
 0x2bf   :  { %v2029_v33 = vadd.f32 %v3568_v25, %v1910_v62  ;;  %v1909_v16 = vadd.f32 %v1886_v38, %v1790_v58  ;;  %v2050_v49 = vmax.f32 %v2042_v45, 0.0  ;;  %v2041_v50 = vadd.f32 %v2839_v23, %v2026_v0  ;;  %v2142_v58 = vld [vmem:[%s5374_s5 + $0x158] sm:$0xf]  ;;  %v2140_v0 = vld [vmem:[%s5374_s5 + $0x148] sm:$0xff]  ;;  %v2139_v62 = vld [vmem:[%s5374_s5 + $0x140] sm:$0xff] }
 0x2c0   :  { %v3535_v18 = vpop.f32.mrf.mxu1  ;;  %v2138_v45 = vld [vmem:[%s5374_s5 + $0x138] sm:$0xff]  ;;  %v2136_v38 = vld [vmem:[%s5374_s5 + $0x128] sm:$0xff] }
 0x2c1   :  { %v2028_v15 = vadd.f32 %v2005_v31, %v1909_v16  ;;  %v1912_v17 = vadd.f32 %v3535_v18, %v1793_v24  ;;  %2069 = vrot.lane.b32.xlu1 %v2050_v49, %s3753_s27  ;;  %v2049_v19 = vmax.f32 %v2041_v50, 0.0  ;;  %v2044_v41 = vadd.f32 %v2839_v23, %v2029_v33  ;;  %v2099_v31 = vld [vmem:[%s5374_s5] sm:$0xff]  ;;  %v2134_v33 = vld [vmem:[%s5374_s5 + $0x118] sm:$0xff]  ;;  %v2133_v50 = vld [vmem:[%s5374_s5 + $0x110] sm:$0xff] }
 0x2c2   :  { %v1896_v40 = vpop.f32.mrf.mxu1  ;;  %v2135_v24 = vld [vmem:[%s5374_s5 + $0x120] sm:$0xff] }
 0x2c3   :  { %v2031_v3 = vadd.f32 %v3571_v59, %v1912_v17  ;;  %v1911_v51 = vadd.f32 %v1896_v40, %v1792_v26  ;;  %2067 = vrot.lane.b32.xlu0 %v2049_v19, %s3753_s27  ;;  %v2043_v36 = vadd.f32 %v2839_v23, %v2028_v15  ;;  %v2052_v61 = vmax.f32 %v2044_v41, 0.0  ;;  %v2132_v59 = vld [vmem:[%s5374_s5 + $0x108] sm:$0xff]  ;;  %v2473_v26 = vld [vmem:[%s5376_s7 + $0x70] sm:$0xff]  ;;  %v2471_v17 = vld [vmem:[%s5376_s7 + $0x60] sm:$0xff] }
 0x2c4   :  { %v2472_v15 = vld [vmem:[%s5376_s7 + $0x68] sm:$0xff]  ;;  %v2467_v40 = vld [vmem:[%s5376_s7 + $0x40] sm:$0xff] }
 0x2c5   :  { %v2030_v46 = vadd.f32 %v2015_v27, %v1911_v51  ;;  %2065 = vrot.lane.b32.xlu1 %v2048_v56, %s3753_s27  ;;  %v5129_v53 = vadd.f32 %v2839_v23, %v2031_v3  ;;  %v2051_v34 = vmax.f32 %v2043_v36, 0.0  ;;  %v2466_v3 = vld [vmem:[%s5376_s7 + $0x38] sm:$0xff]  ;;  %v2465_v51 = vld [vmem:[%s5376_s7 + $0x30] sm:$0xff]  ;;  %v2463_v41 = vld [vmem:[%s5376_s7 + $0x20] sm:$0xff] }
 0x2c6   :  { %v2462_v27 = vld [vmem:[%s5376_s7 + $0x18] sm:$0xff]  ;;  %v2459_v36 = vld [vmem:[%s5376_s7] sm:$0xff] }
 0x2c7   :  { %2063 = vrot.lane.b32.xlu0 %v2047_v8, %s3753_s27  ;;  %v5131_v9 = vadd.f32 %v2839_v23, %v2030_v46  ;;  %v2054_v13 = vmax.f32 %v5129_v53, 0.0  ;;  %v2461_v46 = vld [vmem:[%s5376_s7 + $0x10] sm:$0xff]  ;;  %v2567_v53 = vld [vmem:[%s5377_s9 + $0x58] sm:$0xff] }
 0x2c9   :  { %2073 = vrot.lane.b32.xlu1 %v2052_v61, %s3753_s27  ;;  %v2053_v52 = vmax.f32 %v5131_v9, 0.0  ;;  %v2565_v9 = vld [vmem:[%s5377_s9 + $0x48] sm:$0xff] }
 0x2cb   :  { %2071 = vrot.lane.b32.xlu0 %v2051_v34, %s3753_s27 }
 0x2cd   :  { %2077 = vrot.lane.b32.xlu1 %v2054_v13, %s3753_s27 }
 0x2cf   :  { %2075 = vrot.lane.b32.xlu0 %v2053_v52, %s3753_s27 }
 0x333   :  { %v2070_v29 = vpop.permute.xlu1 %2069 }
 0x334   :  { %v2090_v42 = vmax.f32 %v2050_v49, %v2070_v29  ;;  %v2562_v29 = vld [vmem:[%s5377_s9 + $0x30] sm:$0xff] }
 0x335   :  { %v2068_v39 = vpop.permute.xlu0 %2067 }
 0x336   :  { %v2089_v12 = vmax.f32 %v2049_v19, %v2068_v39  ;;  %v2470_v19 = vld [vmem:[%s5376_s7 + $0x58] sm:$0xff]  ;;  %v2561_v39 = vld [vmem:[%s5377_s9 + $0x28] sm:$0xff] }
 0x337   :  { %v2066_v7 = vpop.permute.xlu1 %2065 }
 0x338   :  { %v2096_v14 = vmax.f32 %v2089_v12, %v2090_v42  ;;  %v2088_v47 = vmax.f32 %v2048_v56, %v2066_v7  ;;  %v2464_v56 = vld [vmem:[%s5376_s7 + $0x28] sm:$0xff]  ;;  %v2560_v42 = vld [vmem:[%s5377_s9 + $0x20] sm:$0xff]  ;;  %v2559_v12 = vld [vmem:[%s5377_s9 + $0x18] sm:$0xff] }
 0x339   :  { %v2064_v28 = vpop.permute.xlu0 %2063 }
 0x33a   :  { %3595 = vmatmul.mubr.msk.f32.vlgmr.msra.gmra.mxu1 %vm2143_vm4, %v2096_v14  ;;  %v2087_v23 = vmax.f32 %v2047_v8, %v2064_v28  ;;  %v2460_v8 = vld [vmem:[%s5376_s7 + $0x8] sm:$0xff] }
 0x33b   :  { %3598 = vmatpush3.msk.msra.mxu1 %vm159_vm0, %v2109_v63  ;;  %v2074_v25 = vpop.permute.xlu1 %2073  ;;  %3619 = vmatprep.mubr.msk.f32.mxu1 %vm3752_vm3, %v3751_v30 }
 0x33c   :  { %3599 = vmatprep.subr.mxu1 %v3751_v30  ;;  %v2092_v1 = vmax.f32 %v2052_v61, %v2074_v25  ;;  %v2095_v60 = vmax.f32 %v2087_v23, %v2088_v47  ;;  %v2568_v61 = vld [vmem:[%s5377_s9 + $0x60] sm:$0xf] }
 0x33d   :  { %3600 = vmatpush3.msra.mxu1 %v2108_v55  ;;  %v2072_v54 = vpop.permute.xlu0 %2071  ;;  %v2849_v23 = vld [vmem:[%s5379_s8] ss:$0 sm:$0xff] }
 0x33e   :  { %3601 = vmatprep.subr.mxu1 %v3751_v30  ;;  %v2091_v4 = vmax.f32 %v2051_v34, %v2072_v54  ;;  %v2566_v34 = vld [vmem:[%s5377_s9 + $0x50] sm:$0xff] }
 0x33f   :  { %3602 = vmatpush3.msra.mxu1 %v2107_v44  ;;  %v2078_v16 = vpop.permute.xlu1 %2077 }
 0x340   :  { %v2097_v48 = vmax.f32 %v2091_v4, %v2092_v1  ;;  %3603 = vmatprep.subr.mxu1 %v3751_v30  ;;  %v2094_v21 = vmax.f32 %v2054_v13, %v2078_v16  ;;  %v2564_v13 = vld [vmem:[%s5377_s9 + $0x40] sm:$0xff] }
 0x341   :  { %3604 = vmatpush3.msra.mxu1 %v2106_v37  ;;  %v2076_v2 = vpop.permute.xlu0 %2075  ;;  %v2848_v4 = vld [vmem:[%s5378_s6] ss:$0 sm:$0xff] }
 0x342   :  { %3605 = vmatprep.subr.mxu1 %v3751_v30  ;;  %3645 = vmatmul.mubr.msk.f32.vlgmr.msra.gmra.mxu0 %vm2143_vm4, %v2097_v48  ;;  %v2093_v49 = vmax.f32 %v2053_v52, %v2076_v2  ;;  %v2563_v52 = vld [vmem:[%s5377_s9 + $0x38] sm:$0xff] }
 0x343   :  { %3606 = vmatpush3.msra.mxu1 %v2105_v20  ;;  %3702 = vmatprep.mubr.msk.f32.mxu0 %vm3752_vm3, %v3751_v30 }
 0x344   :  { %3607 = vmatprep.subr.mxu1 %v3751_v30  ;;  %v2098_v18 = vmax.f32 %v2093_v49, %v2094_v21  ;;  %3673 = vmatpush3.msra.mxu0 %v2473_v26 }
 0x345   :  { %3608 = vmatpush3.msra.mxu1 %v2104_v22  ;;  %3674 = vmatprep.subr.mxu0 %v3751_v30 }
 0x346   :  { %3609 = vmatprep.subr.mxu1 %v3751_v30  ;;  %3675 = vmatpush3.msra.mxu0 %v2472_v15 }
 0x347   :  { %3610 = vmatpush3.msra.mxu1 %v2103_v43  ;;  %3676 = vmatprep.subr.mxu0 %v3751_v30  ;;  %v2558_v43 = vld [vmem:[%s5377_s9 + $0x10] sm:$0xff] }
 0x348   :  { %3611 = vmatprep.subr.mxu1 %v3751_v30  ;;  %3677 = vmatpush3.msra.mxu0 %v2471_v17 }
 0x349   :  { %3612 = vmatpush3.msra.mxu1 %v2102_v32  ;;  %3678 = vmatprep.subr.mxu0 %v3751_v30  ;;  %v2557_v32 = vld [vmem:[%s5377_s9 + $0x8] sm:$0xff] }
 0x34a   :  { %3613 = vmatprep.subr.mxu1 %v3751_v30  ;;  %3679 = vmatpush3.msra.mxu0 %v2470_v19 }
 0x34b   :  { %3614 = vmatpush3.msra.mxu1 %v2101_v57  ;;  %3680 = vmatprep.subr.mxu0 %v3751_v30  ;;  %v2556_v57 = vld [vmem:[%s5377_s9] sm:$0xff] }
 0x34c   :  { %3615 = vmatprep.subr.mxu1 %v3751_v30  ;;  %3681 = vmatpush3.msra.mxu0 %v2469_v35 }
 0x34d   :  { %3616 = vmatpush3.msra.mxu1 %v2100_v6  ;;  %3682 = vmatprep.subr.mxu0 %v3751_v30 }
 0x34e   :  { %3617 = vmatprep.subr.mxu1 %v3751_v30  ;;  %3683 = vmatpush3.msra.mxu0 %v2468_v11 }
 0x34f   :  { %3618 = vmatpush3.msra.mxu1 %v2099_v31  ;;  %3684 = vmatprep.subr.mxu0 %v3751_v30 }
 0x350   :  { %3620 = vmatmul.mubr.msk.f32.vlgmr.msra.gmra.mxu1 %vm2143_vm4, %v2095_v60  ;;  %3647 = vmatprep.subr.mxu1 %v3751_v30 }
 0x351   :  { %3648 = vmatpush3.msk.msra.mxu1 %vm159_vm0, %v2142_v58  ;;  %3669 = vmatprep.mubr.msk.f32.mxu1 %vm3752_vm3, %v3751_v30  ;;  %v2851_v58 = vld [vmem:[%s5380_s10] ss:$0 sm:$0xff] }
 0x352   :  { %3649 = vmatprep.subr.mxu1 %v3751_v30  ;;  %3685 = vmatpush3.msra.mxu0 %v2467_v40 }
 0x353   :  { %3650 = vmatpush3.msra.mxu1 %v2141_v5  ;;  %3686 = vmatprep.subr.mxu0 %v3751_v30 }
 0x354   :  { %3651 = vmatprep.subr.mxu1 %v3751_v30  ;;  %3687 = vmatpush3.msra.mxu0 %v2466_v3 }
 0x355   :  { %3652 = vmatpush3.msra.mxu1 %v2140_v0  ;;  %3688 = vmatprep.subr.mxu0 %v3751_v30 }
 0x356   :  { %3653 = vmatprep.subr.mxu1 %v3751_v30  ;;  %3689 = vmatpush3.msra.mxu0 %v2465_v51 }
 0x357   :  { %3654 = vmatpush3.msra.mxu1 %v2139_v62  ;;  %3690 = vmatprep.subr.mxu0 %v3751_v30 }
 0x358   :  { %3655 = vmatprep.subr.mxu1 %v3751_v30  ;;  %3691 = vmatpush3.msra.mxu0 %v2464_v56 }
 0x359   :  { %3656 = vmatpush3.msra.mxu1 %v2138_v45  ;;  %3692 = vmatprep.subr.mxu0 %v3751_v30 }
 0x35a   :  { %3657 = vmatprep.subr.mxu1 %v3751_v30  ;;  %3693 = vmatpush3.msra.mxu0 %v2463_v41 }
 0x35b   :  { %3658 = vmatpush3.msra.mxu1 %v2137_v10  ;;  %3694 = vmatprep.subr.mxu0 %v3751_v30 }
 0x35c   :  { %3659 = vmatprep.subr.mxu1 %v3751_v30  ;;  %3695 = vmatpush3.msra.mxu0 %v2462_v27 }
 0x35d   :  { %3660 = vmatpush3.msra.mxu1 %v2136_v38  ;;  %3696 = vmatprep.subr.mxu0 %v3751_v30 }
 0x35e   :  { %3661 = vmatprep.subr.mxu1 %v3751_v30  ;;  %3697 = vmatpush3.msra.mxu0 %v2461_v46 }
 0x35f   :  { %3662 = vmatpush3.msra.mxu1 %v2135_v24  ;;  %3698 = vmatprep.subr.mxu0 %v3751_v30 }
 0x360   :  { %3663 = vmatprep.subr.mxu1 %v3751_v30  ;;  %3699 = vmatpush3.msra.mxu0 %v2460_v8 }
 0x361   :  { %3664 = vmatpush3.msra.mxu1 %v2134_v33  ;;  %3700 = vmatprep.subr.mxu0 %v3751_v30 }
 0x362   :  { %3665 = vmatprep.subr.mxu1 %v3751_v30  ;;  %3701 = vmatpush3.msra.mxu0 %v2459_v36 }
 0x363   :  { %3666 = vmatpush3.msra.mxu1 %v2133_v50 }
 0x364   :  { %3667 = vmatprep.subr.mxu1 %v3751_v30 }
 0x365   :  { %3668 = vmatpush3.msra.mxu1 %v2132_v59 }
 0x366   :  { %3670 = vmatmul.mubr.msk.f32.vlgmr.msra.gmra.mxu1 %vm2143_vm4, %v2098_v18  ;;  %3705 = vmatprep.subr.mxu1 %v3751_v30 }
 0x367   :  { %3731 = vmatprep.mubr.msk.f32.mxu1 %vm3752_vm3, %v3751_v30  ;;  %3706 = vmatpush3.msk.msra.mxu1 %vm159_vm0, %v2568_v61 }
 0x368   :  { %3707 = vmatprep.subr.mxu1 %v3751_v30 }
 0x369   :  { %3708 = vmatpush3.msra.mxu1 %v2567_v53 }
 0x36a   :  { %3709 = vmatprep.subr.mxu1 %v3751_v30 }
 0x36b   :  { %3710 = vmatpush3.msra.mxu1 %v2566_v34 }
 0x36c   :  { %3711 = vmatprep.subr.mxu1 %v3751_v30 }
 0x36d   :  { %3712 = vmatpush3.msra.mxu1 %v2565_v9 }
 0x36e   :  { %3713 = vmatprep.subr.mxu1 %v3751_v30 }
 0x36f   :  { %3714 = vmatpush3.msra.mxu1 %v2564_v13 }
 0x370   :  { %3715 = vmatprep.subr.mxu1 %v3751_v30 }
 0x371   :  { %3716 = vmatpush3.msra.mxu1 %v2563_v52 }
 0x372   :  { %3717 = vmatprep.subr.mxu1 %v3751_v30 }
 0x373   :  { %3718 = vmatpush3.msra.mxu1 %v2562_v29 }
 0x374   :  { %3719 = vmatprep.subr.mxu1 %v3751_v30 }
 0x375   :  { %3720 = vmatpush3.msra.mxu1 %v2561_v39 }
 0x376   :  { %3721 = vmatprep.subr.mxu1 %v3751_v30 }
 0x377   :  { %3722 = vmatpush3.msra.mxu1 %v2560_v42 }
 0x378   :  { %3723 = vmatprep.subr.mxu1 %v3751_v30 }
 0x379   :  { %3724 = vmatpush3.msra.mxu1 %v2559_v12 }
 0x37a   :  { %3725 = vmatprep.subr.mxu1 %v3751_v30 }
 0x37b   :  { %3726 = vmatpush3.msra.mxu1 %v2558_v43 }
 0x37c   :  { %3727 = vmatprep.subr.mxu1 %v3751_v30 }
 0x37d   :  { %3728 = vmatpush3.msra.mxu1 %v2557_v32 }
 0x37e   :  { %3729 = vmatprep.subr.mxu1 %v3751_v30 }
 0x37f   :  { %3730 = vmatpush3.msra.mxu1 %v2556_v57 }
 0x3fa   :  { %v2216_v7 = vpop.f32.mrf.mxu1 }
 0x3fc   :  { %v3596_v14 = vpop.f32.mrf.mxu1 }
 0x402   :  { %v2368_v63 = vpop.f32.mrf.mxu0 }
 0x404   :  { %v3646_v28 = vpop.f32.mrf.mxu0 }
 0x410   :  { %v2292_v55 = vpop.f32.mrf.mxu1 }
 0x411   :  { %v2293_v44 = vadd.f32 %v2292_v55, %v2216_v7 }
 0x412   :  { %v3621_v25 = vpop.f32.mrf.mxu1 }
 0x413   :  { %v2372_v54 = vadd.f32 %v2368_v63, %v2293_v44 }
 0x426   :  { %v2445_v1 = vpop.f32.mrf.mxu1 }
 0x427   :  { %v2449_v37 = vadd.f32 %v2445_v1, %v2372_v54 }
 0x428   :  { %v3671_v48 = vpop.f32.mrf.mxu1 }
 0x429   :  { %v2457_v20 = vadd.f32 %v2848_v4, %v2449_v37 }
 0x42b   :  { %v2458_v22 = vmax.f32 %v2457_v20, 0.0 }
 0x42d   :  { %3703 = vmatmul.mubr.msk.f32.vlgmr.msra.gmra.mxu0 %vm2481_vm5, %v2458_v22 }
 0x4ed   :  { %v2551_v6 = vpop.f32.mrf.mxu0 }
 0x4ee   :  { %v2552_v47 = vadd.f32 %v2849_v23, %v2551_v6 }
 0x4ef   :  { %v3704_v31 = vpop.f32.mrf.mxu0 }
 0x4f0   :  { %v2555_v60 = vmax.f32 %v2552_v47, 0.0 }
 0x4f2   :  { %3732 = vmatmul.mubr.msk.f32.vlgmr.msra.gmra.mxu1 %vm2576_vm6, %v2555_v60 }
 0x5b2   :  { %v2649_v30 = vpop.f32.mrf.mxu1 }
 0x5b3   :  { %v2650_v5 = vadd.f32 %v2851_v58, %v2649_v30 }
 0x5b4   :  { %v3733_v0 = vpop.f32.mrf.mxu1 }
 0x5b5   :  { %2653 = vmax.xlane.f32.xlu0 %v2650_v5 }
 0x63e   :  { %v2654_v62 = vpop.xlane.xlu0 %2653 }
 0x63f   :  { %v2655_v45 = vsub.f32 %v2650_v5, %v2654_v62 }
 0x641   :  { %v2656_v10 = vmul.f32 1.442695, %v2655_v45 }
 0x643   :  { %3746 = vpow2.f32 %v2656_v10 }
 0x650   :  { %v3747_v38 = vpop.eup %3746 }
 0x651   :  { %2658 = vadd.xlane.f32.xlu1 %v3747_v38 }
 0x6da   :  { %v2659_v24 = vpop.xlane.xlu1 %2658 }
 0x6db   :  { %3748 = vlog2.f32 %v2659_v24 }
 0x6e8   :  { %v3749_v2 = vpop.eup %3748 }
 0x6e9   :  { %v2661_v33 = vmul.f32 0.6931472, %v3749_v2 }
 0x6eb   :  { %v2662_v16 = vsub.f32 %v2655_v45, %v2661_v33 }
 0x6ed   :  { %2663 = vst [vmem:[%s5381_s11] sm:$0xff] %v2662_v16 }

</bundles_post_ra>
